<compile_context>
chip_gen: v7x
topology: tpu7x:2x2x1
jax: 0.10.0
libtpu: 0.0.40
codegen_flags: <defaults>
</compile_context>

<pallas_src>
import jax
import jax.numpy as jnp
from jax.experimental import pallas as pl
from jax.experimental.pallas import tpu as pltpu


# ----------------------------------------------------------------------------
# Fused kernel: embedding Linear + all n_layers GCLs + output Linear.
# ----------------------------------------------------------------------------
def _build_gnn_kernel(n_layers: int, use_node_mask: bool):
    def kernel(h0_ref, grow_ref, gcol_ref, scatT_ref, eproj_ref, nmask_ref,
               emb_w_ref, emb_b_ref, out_w_ref, out_b_ref,
               w1a_ref, w1b_ref, w2_ref, b2_ref,
               w3a_ref, w3b_ref, b3_ref, w4_ref, b4_ref,
               out_ref):
        def dot(a, b):
            return jnp.dot(a, b, preferred_element_type=jnp.float32)

        def silu(x):
            return x * jax.nn.sigmoid(x)

        bf16 = jnp.bfloat16

        grow = grow_ref[...]            # [E, N] bf16 one_hot(row)
        gcol = gcol_ref[...]            # [E, N] bf16 one_hot(col)
        scatT = scatT_ref[...]          # [N, E] bf16 (one_hot(row) * edge_mask)^T
        nmask = nmask_ref[...]          # [N, 1] f32 (only read if use_node_mask)

        # --- input embedding --------------------------------------------------
        h = dot(h0_ref[...], emb_w_ref[...]) + emb_b_ref[...]       # [N, H] f32

        # --- statically unrolled GCL layers (weights fully VMEM-resident) ----
        for l in range(n_layers):
            # project-then-gather: node-table matmuls, then one-hot gather (MXU)
            p = dot(h, w1a_ref[l])                                   # [N, H]
            q = dot(h, w1b_ref[l])                                   # [N, H]
            m = (dot(grow, p.astype(bf16))
                 + dot(gcol, q.astype(bf16))
                 + eproj_ref[l])          # eproj = edge_attr @ W1c + b1 (prefolded)
            m = silu(m)                                              # [E, H]
            m = silu(dot(m, w2_ref[l]) + b2_ref[l])                  # [E, H]

            # unsorted_segment_sum(m * edge_mask, row, N) as one MXU matmul
            agg = dot(scatT, m.astype(bf16))                         # [N, H]

            # node MLP + recurrent residual
            n = silu(dot(h, w3a_ref[l]) + dot(agg, w3b_ref[l]) + b3_ref[l])
            n = dot(n, w4_ref[l]) + b4_ref[l]
            h = h + n
            if use_node_mask:
                h = h * nmask

        # --- output projection ------------------------------------------------
        out = dot(h, out_w_ref[...]) + out_b_ref[...]
        if use_node_mask:
            out = out * nmask
        out_ref[...] = out

    return kernel


# ----------------------------------------------------------------------------
# Forward wrapper
# ----------------------------------------------------------------------------
def gnn_forward(params, h, edges, edge_attr, node_mask=None, edge_mask=None):
    rows, cols = edges
    n_nodes = h.shape[0]
    n_edges = rows.shape[0]
    out_nf = params["out_w"].shape[1]
    layers = params["layers"]
    n_layers = len(layers)
    assert n_layers >= 1

    # bf16 one-hot gather matrices (0/1 exact in bf16)
    grow = jax.nn.one_hot(rows, n_nodes, dtype=jnp.bfloat16)        # [E, N]
    gcol = jax.nn.one_hot(cols, n_nodes, dtype=jnp.bfloat16)        # [E, N]

    # scatter matrix = one_hot(row)^T with (binary) edge_mask folded in,
    # pre-transposed so the kernel never transposes an [E,N] tile.
    if edge_mask is not None:
        emask = edge_mask.astype(jnp.bfloat16).reshape(n_edges, 1)
        scatT = (grow * emask).T                                     # [N, E]
    else:
        scatT = grow.T                                               # [N, E]

    if node_mask is not None:
        nmask = node_mask.astype(jnp.float32).reshape(n_nodes, 1)
    else:
        nmask = jnp.ones((n_nodes, 1), jnp.float32)

    # fold the K=2 contraction edge_attr @ W1c (+ b1) per layer, host side
    eproj = jnp.stack([edge_attr @ p["w1c"] + p["b1"].reshape(1, -1)
                       for p in layers])                             # [L, E, H]

    stack = lambda name: jnp.stack([p[name] for p in layers])
    stack_b = lambda name: jnp.stack([p[name].reshape(1, -1) for p in layers])

    args = (
        h, grow, gcol, scatT, eproj, nmask,
        params["emb_w"], params["emb_b"].reshape(1, -1),
        params["out_w"], params["out_b"].reshape(1, -1),
        stack("w1a"), stack("w1b"),
        stack("w2"), stack_b("b2"),
        stack("w3a"), stack("w3b"), stack_b("b3"),
        stack("w4"), stack_b("b4"),
    )

    vmem = pl.BlockSpec(memory_space=pltpu.MemorySpace.VMEM)
    return pl.pallas_call(
        _build_gnn_kernel(n_layers, node_mask is not None),
        out_shape=jax.ShapeDtypeStruct((n_nodes, out_nf), jnp.float32),
        in_specs=[vmem] * len(args),
        out_specs=vmem,
    )(*args)


# ----------------------------------------------------------------------------
# Parameter construction (torch-Linear-shaped, pre-transposed, deterministic)
# ----------------------------------------------------------------------------
def _init_linear(key, fan_in, fan_out):
    kw, kb = jax.random.split(key)
    bound = 1.0 / jnp.sqrt(fan_in)
    w = jax.random.uniform(kw, (fan_in, fan_out), jnp.float32, -bound, bound)
    b = jax.random.uniform(kb, (fan_out,), jnp.float32, -bound, bound)
    return w, b


def init_gnn_params(key, in_node_nf, in_edge_nf, hidden_nf, out_node_nf, n_layers):
    keys = jax.random.split(key, 2 + 4 * n_layers)
    params = {}
    params["emb_w"], params["emb_b"] = _init_linear(keys[0], in_node_nf, hidden_nf)
    params["out_w"], params["out_b"] = _init_linear(keys[1], hidden_nf, out_node_nf)
    params["layers"] = []
    for i in range(n_layers):
        k0, k1, k2, k3 = keys[2 + 4 * i: 6 + 4 * i]
        # edge_mlp[0]: Linear(2H + edges_in_d, H) -- split into src/tgt/attr blocks
        w1, b1 = _init_linear(k0, 2 * hidden_nf + in_edge_nf, hidden_nf)
        w2, b2 = _init_linear(k1, hidden_nf, hidden_nf)
        # node_mlp[0]: Linear(2H, H) -- split into x/agg blocks
        w3, b3 = _init_linear(k2, 2 * hidden_nf, hidden_nf)
        w4, b4 = _init_linear(k3, hidden_nf, hidden_nf)
        params["layers"].append(dict(
            w1a=w1[:hidden_nf], w1b=w1[hidden_nf:2 * hidden_nf],
            w1c=w1[2 * hidden_nf:], b1=b1,
            w2=w2, b2=b2,
            w3a=w3[:hidden_nf], w3b=w3[hidden_nf:], b3=b3,
            w4=w4, b4=b4,
        ))
    return params


# pure-JAX reference (mirrors the PyTorch module exactly) for verification
def gnn_reference(params, h, edges, edge_attr, node_mask=None, edge_mask=None):
    rows, cols = edges
    n_nodes = h.shape[0]
    silu = lambda x: x * jax.nn.sigmoid(x)

    h = h @ params["emb_w"] + params["emb_b"]
    for p in params["layers"]:
        src, tgt = h[rows], h[cols]
        m = silu(src @ p["w1a"] + tgt @ p["w1b"] + edge_attr @ p["w1c"] + p["b1"])
        m = silu(m @ p["w2"] + p["b2"])
        if edge_mask is not None:
            m = m * edge_mask
        agg = jax.ops.segment_sum(m, rows, num_segments=n_nodes)
        n = silu(h @ p["w3a"] + agg @ p["w3b"] + p["b3"])
        n = n @ p["w4"] + p["b4"]
        h = h + n
        if node_mask is not None:
            h = h * node_mask
    h = h @ params["out_w"] + params["out_b"]
    if node_mask is not None:
        h = h * node_mask
    return h


if __name__ == "__main__":
    # small shapes: N=8 nodes, fully-connected directed edges E=56, hidden=32
    in_node_nf, in_edge_nf, hidden_nf, out_node_nf, n_layers = 4, 2, 32, 4, 4
    n_nodes = 8

    key = jax.random.PRNGKey(0)
    k_par, k_h, k_e = jax.random.split(key, 3)
    params = init_gnn_params(k_par, in_node_nf, in_edge_nf, hidden_nf,
                             out_node_nf, n_layers)

    rows, cols = [], []
    for i in range(n_nodes):
        for j in range(n_nodes):
            if i != j:
                rows.append(i)
                cols.append(j)
    rows = jnp.asarray(rows, jnp.int32)
    cols = jnp.asarray(cols, jnp.int32)
    n_edges = rows.shape[0]

    h = jax.random.normal(k_h, (n_nodes, in_node_nf), jnp.float32)
    edge_attr = jax.random.normal(k_e, (n_edges, in_edge_nf), jnp.float32)

    # --- unmasked path -------------------------------------------------------
    out = jax.block_until_ready(gnn_forward(params, h, (rows, cols), edge_attr))
    ref = gnn_reference(params, h, (rows, cols), edge_attr)
    assert out.shape == (n_nodes, out_node_nf)
    # bf16 gather/scatter MXU operands -> tolerance covers bf16 rounding
    assert jnp.allclose(out, ref, atol=1e-2, rtol=1e-2), (
        f"mismatch vs reference (max abs err={float(jnp.max(jnp.abs(out - ref)))})")

    # --- masked path (binary masks; edge_mask folded into scatter matrix) ----
    node_mask = (jnp.arange(n_nodes) < n_nodes - 1).astype(jnp.float32).reshape(-1, 1)
    edge_mask = (node_mask[rows, 0] * node_mask[cols, 0]).reshape(-1, 1)
    out_m = jax.block_until_ready(
        gnn_forward(params, h, (rows, cols), edge_attr, node_mask, edge_mask))
    ref_m = gnn_reference(params, h, (rows, cols), edge_attr, node_mask, edge_mask)
    assert jnp.allclose(out_m, ref_m, atol=1e-2, rtol=1e-2), (
        f"masked mismatch (max abs err={float(jnp.max(jnp.abs(out_m - ref_m)))})")

    print("KERNEL_OK")
</pallas_src>

<mosaic_0001>
module attributes {stable_mosaic.version = 11 : i64} {
  func.func @kernel(%arg0: memref<8x4xf32, #tpu.memory_space<vmem>>, %arg1: memref<56x8xbf16, #tpu.memory_space<vmem>>, %arg2: memref<56x8xbf16, #tpu.memory_space<vmem>>, %arg3: memref<8x56xbf16, #tpu.memory_space<vmem>>, %arg4: memref<4x56x32xf32, #tpu.memory_space<vmem>>, %arg5: memref<8x1xf32, #tpu.memory_space<vmem>>, %arg6: memref<4x32xf32, #tpu.memory_space<vmem>>, %arg7: memref<1x32xf32, #tpu.memory_space<vmem>>, %arg8: memref<32x4xf32, #tpu.memory_space<vmem>>, %arg9: memref<1x4xf32, #tpu.memory_space<vmem>>, %arg10: memref<4x32x32xf32, #tpu.memory_space<vmem>>, %arg11: memref<4x32x32xf32, #tpu.memory_space<vmem>>, %arg12: memref<4x32x32xf32, #tpu.memory_space<vmem>>, %arg13: memref<4x1x32xf32, #tpu.memory_space<vmem>>, %arg14: memref<4x32x32xf32, #tpu.memory_space<vmem>>, %arg15: memref<4x32x32xf32, #tpu.memory_space<vmem>>, %arg16: memref<4x1x32xf32, #tpu.memory_space<vmem>>, %arg17: memref<4x32x32xf32, #tpu.memory_space<vmem>>, %arg18: memref<4x1x32xf32, #tpu.memory_space<vmem>>, %arg19: memref<8x4xf32, #tpu.memory_space<vmem>>) attributes {dimension_semantics = [], scalar_prefetch = 0 : i64, scratch_operands = 0 : i64, tpu.core_type = #tpu.core_type<tc>} {
    %c0 = arith.constant 0 : index
    %c0_0 = arith.constant 0 : index
    %0 = vector.load %arg1[%c0, %c0_0] : memref<56x8xbf16, #tpu.memory_space<vmem>>, vector<56x8xbf16>
    %c0_1 = arith.constant 0 : index
    %c0_2 = arith.constant 0 : index
    %1 = vector.load %arg2[%c0_1, %c0_2] : memref<56x8xbf16, #tpu.memory_space<vmem>>, vector<56x8xbf16>
    %c0_3 = arith.constant 0 : index
    %c0_4 = arith.constant 0 : index
    %2 = vector.load %arg3[%c0_3, %c0_4] : memref<8x56xbf16, #tpu.memory_space<vmem>>, vector<8x56xbf16>
    %c0_5 = arith.constant 0 : index
    %c0_6 = arith.constant 0 : index
    %3 = vector.load %arg0[%c0_5, %c0_6] : memref<8x4xf32, #tpu.memory_space<vmem>>, vector<8x4xf32>
    %c0_7 = arith.constant 0 : index
    %c0_8 = arith.constant 0 : index
    %4 = vector.load %arg6[%c0_7, %c0_8] : memref<4x32xf32, #tpu.memory_space<vmem>>, vector<4x32xf32>
    %cst = arith.constant dense<0.000000e+00> : vector<8x32xf32>
    %5 = tpu.matmul %3, %4, %cst {dimension_numbers = #tpu.dot_dimension_numbers<[1], [0], [0], [1], [0, 0, 1, 1], [], []>} : vector<8x4xf32>, vector<4x32xf32>, vector<8x32xf32> -> vector<8x32xf32>
    %c0_9 = arith.constant 0 : index
    %c0_10 = arith.constant 0 : index
    %6 = vector.load %arg7[%c0_9, %c0_10] : memref<1x32xf32, #tpu.memory_space<vmem>>, vector<1x32xf32>
    %7 = vector.broadcast %6 : vector<1x32xf32> to vector<8x32xf32>
    %8 = arith.addf %5, %7 : vector<8x32xf32>
    %c0_11 = arith.constant 0 : index
    %c0_12 = arith.constant 0 : index
    %c0_13 = arith.constant 0 : index
    %9 = vector.load %arg10[%c0_11, %c0_12, %c0_13] : memref<4x32x32xf32, #tpu.memory_space<vmem>>, vector<1x32x32xf32>
    %10 = vector.shape_cast %9 : vector<1x32x32xf32> to vector<32x32xf32>
    %cst_14 = arith.constant dense<0.000000e+00> : vector<8x32xf32>
    %11 = tpu.matmul %8, %10, %cst_14 {dimension_numbers = #tpu.dot_dimension_numbers<[1], [0], [0], [1], [0, 0, 1, 1], [], []>} : vector<8x32xf32>, vector<32x32xf32>, vector<8x32xf32> -> vector<8x32xf32>
    %c0_15 = arith.constant 0 : index
    %c0_16 = arith.constant 0 : index
    %c0_17 = arith.constant 0 : index
    %12 = vector.load %arg11[%c0_15, %c0_16, %c0_17] : memref<4x32x32xf32, #tpu.memory_space<vmem>>, vector<1x32x32xf32>
    %13 = vector.shape_cast %12 : vector<1x32x32xf32> to vector<32x32xf32>
    %cst_18 = arith.constant dense<0.000000e+00> : vector<8x32xf32>
    %14 = tpu.matmul %8, %13, %cst_18 {dimension_numbers = #tpu.dot_dimension_numbers<[1], [0], [0], [1], [0, 0, 1, 1], [], []>} : vector<8x32xf32>, vector<32x32xf32>, vector<8x32xf32> -> vector<8x32xf32>
    %15 = arith.truncf %11 : vector<8x32xf32> to vector<8x32xbf16>
    %cst_19 = arith.constant dense<0.000000e+00> : vector<56x32xf32>
    %16 = tpu.matmul %0, %15, %cst_19 {dimension_numbers = #tpu.dot_dimension_numbers<[1], [0], [0], [1], [0, 0, 1, 1], [], []>} : vector<56x8xbf16>, vector<8x32xbf16>, vector<56x32xf32> -> vector<56x32xf32>
    %17 = arith.truncf %14 : vector<8x32xf32> to vector<8x32xbf16>
    %cst_20 = arith.constant dense<0.000000e+00> : vector<56x32xf32>
    %18 = tpu.matmul %1, %17, %cst_20 {dimension_numbers = #tpu.dot_dimension_numbers<[1], [0], [0], [1], [0, 0, 1, 1], [], []>} : vector<56x8xbf16>, vector<8x32xbf16>, vector<56x32xf32> -> vector<56x32xf32>
    %19 = arith.addf %16, %18 : vector<56x32xf32>
    %c0_21 = arith.constant 0 : index
    %c0_22 = arith.constant 0 : index
    %c0_23 = arith.constant 0 : index
    %20 = vector.load %arg4[%c0_21, %c0_22, %c0_23] : memref<4x56x32xf32, #tpu.memory_space<vmem>>, vector<1x56x32xf32>
    %21 = vector.shape_cast %20 : vector<1x56x32xf32> to vector<56x32xf32>
    %22 = arith.addf %19, %21 : vector<56x32xf32>
    %23 = arith.negf %22 : vector<56x32xf32>
    %24 = math.exp %23 : vector<56x32xf32>
    %cst_24 = arith.constant 1.000000e+00 : f32
    %25 = vector.broadcast %cst_24 : f32 to vector<56x32xf32>
    %26 = arith.addf %25, %24 : vector<56x32xf32>
    %27 = arith.divf %25, %26 : vector<56x32xf32>
    %28 = arith.mulf %22, %27 : vector<56x32xf32>
    %c0_25 = arith.constant 0 : index
    %c0_26 = arith.constant 0 : index
    %c0_27 = arith.constant 0 : index
    %29 = vector.load %arg12[%c0_25, %c0_26, %c0_27] : memref<4x32x32xf32, #tpu.memory_space<vmem>>, vector<1x32x32xf32>
    %30 = vector.shape_cast %29 : vector<1x32x32xf32> to vector<32x32xf32>
    %cst_28 = arith.constant dense<0.000000e+00> : vector<56x32xf32>
    %31 = tpu.matmul %28, %30, %cst_28 {dimension_numbers = #tpu.dot_dimension_numbers<[1], [0], [0], [1], [0, 0, 1, 1], [], []>} : vector<56x32xf32>, vector<32x32xf32>, vector<56x32xf32> -> vector<56x32xf32>
    %c0_29 = arith.constant 0 : index
    %c0_30 = arith.constant 0 : index
    %c0_31 = arith.constant 0 : index
    %32 = vector.load %arg13[%c0_29, %c0_30, %c0_31] : memref<4x1x32xf32, #tpu.memory_space<vmem>>, vector<1x1x32xf32>
    %33 = vector.shape_cast %32 : vector<1x1x32xf32> to vector<1x32xf32>
    %34 = vector.broadcast %33 : vector<1x32xf32> to vector<56x32xf32>
    %35 = arith.addf %31, %34 : vector<56x32xf32>
    %36 = arith.negf %35 : vector<56x32xf32>
    %37 = math.exp %36 : vector<56x32xf32>
    %cst_32 = arith.constant 1.000000e+00 : f32
    %38 = vector.broadcast %cst_32 : f32 to vector<56x32xf32>
    %39 = arith.addf %38, %37 : vector<56x32xf32>
    %40 = arith.divf %38, %39 : vector<56x32xf32>
    %41 = arith.mulf %35, %40 : vector<56x32xf32>
    %42 = arith.truncf %41 : vector<56x32xf32> to vector<56x32xbf16>
    %cst_33 = arith.constant dense<0.000000e+00> : vector<8x32xf32>
    %43 = tpu.matmul %2, %42, %cst_33 {dimension_numbers = #tpu.dot_dimension_numbers<[1], [0], [0], [1], [0, 0, 1, 1], [], []>} : vector<8x56xbf16>, vector<56x32xbf16>, vector<8x32xf32> -> vector<8x32xf32>
    %c0_34 = arith.constant 0 : index
    %c0_35 = arith.constant 0 : index
    %c0_36 = arith.constant 0 : index
    %44 = vector.load %arg14[%c0_34, %c0_35, %c0_36] : memref<4x32x32xf32, #tpu.memory_space<vmem>>, vector<1x32x32xf32>
    %45 = vector.shape_cast %44 : vector<1x32x32xf32> to vector<32x32xf32>
    %cst_37 = arith.constant dense<0.000000e+00> : vector<8x32xf32>
    %46 = tpu.matmul %8, %45, %cst_37 {dimension_numbers = #tpu.dot_dimension_numbers<[1], [0], [0], [1], [0, 0, 1, 1], [], []>} : vector<8x32xf32>, vector<32x32xf32>, vector<8x32xf32> -> vector<8x32xf32>
    %c0_38 = arith.constant 0 : index
    %c0_39 = arith.constant 0 : index
    %c0_40 = arith.constant 0 : index
    %47 = vector.load %arg15[%c0_38, %c0_39, %c0_40] : memref<4x32x32xf32, #tpu.memory_space<vmem>>, vector<1x32x32xf32>
    %48 = vector.shape_cast %47 : vector<1x32x32xf32> to vector<32x32xf32>
    %cst_41 = arith.constant dense<0.000000e+00> : vector<8x32xf32>
    %49 = tpu.matmul %43, %48, %cst_41 {dimension_numbers = #tpu.dot_dimension_numbers<[1], [0], [0], [1], [0, 0, 1, 1], [], []>} : vector<8x32xf32>, vector<32x32xf32>, vector<8x32xf32> -> vector<8x32xf32>
    %50 = arith.addf %46, %49 : vector<8x32xf32>
    %c0_42 = arith.constant 0 : index
    %c0_43 = arith.constant 0 : index
    %c0_44 = arith.constant 0 : index
    %51 = vector.load %arg16[%c0_42, %c0_43, %c0_44] : memref<4x1x32xf32, #tpu.memory_space<vmem>>, vector<1x1x32xf32>
    %52 = vector.shape_cast %51 : vector<1x1x32xf32> to vector<1x32xf32>
    %53 = vector.broadcast %52 : vector<1x32xf32> to vector<8x32xf32>
    %54 = arith.addf %50, %53 : vector<8x32xf32>
    %55 = arith.negf %54 : vector<8x32xf32>
    %56 = math.exp %55 : vector<8x32xf32>
    %cst_45 = arith.constant 1.000000e+00 : f32
    %57 = vector.broadcast %cst_45 : f32 to vector<8x32xf32>
    %58 = arith.addf %57, %56 : vector<8x32xf32>
    %59 = arith.divf %57, %58 : vector<8x32xf32>
    %60 = arith.mulf %54, %59 : vector<8x32xf32>
    %c0_46 = arith.constant 0 : index
    %c0_47 = arith.constant 0 : index
    %c0_48 = arith.constant 0 : index
    %61 = vector.load %arg17[%c0_46, %c0_47, %c0_48] : memref<4x32x32xf32, #tpu.memory_space<vmem>>, vector<1x32x32xf32>
    %62 = vector.shape_cast %61 : vector<1x32x32xf32> to vector<32x32xf32>
    %cst_49 = arith.constant dense<0.000000e+00> : vector<8x32xf32>
    %63 = tpu.matmul %60, %62, %cst_49 {dimension_numbers = #tpu.dot_dimension_numbers<[1], [0], [0], [1], [0, 0, 1, 1], [], []>} : vector<8x32xf32>, vector<32x32xf32>, vector<8x32xf32> -> vector<8x32xf32>
    %c0_50 = arith.constant 0 : index
    %c0_51 = arith.constant 0 : index
    %c0_52 = arith.constant 0 : index
    %64 = vector.load %arg18[%c0_50, %c0_51, %c0_52] : memref<4x1x32xf32, #tpu.memory_space<vmem>>, vector<1x1x32xf32>
    %65 = vector.shape_cast %64 : vector<1x1x32xf32> to vector<1x32xf32>
    %66 = vector.broadcast %65 : vector<1x32xf32> to vector<8x32xf32>
    %67 = arith.addf %63, %66 : vector<8x32xf32>
    %68 = arith.addf %8, %67 : vector<8x32xf32>
    %c1 = arith.constant 1 : index
    %c0_53 = arith.constant 0 : index
    %c0_54 = arith.constant 0 : index
    %69 = vector.load %arg10[%c1, %c0_53, %c0_54] : memref<4x32x32xf32, #tpu.memory_space<vmem>>, vector<1x32x32xf32>
    %70 = vector.shape_cast %69 : vector<1x32x32xf32> to vector<32x32xf32>
    %cst_55 = arith.constant dense<0.000000e+00> : vector<8x32xf32>
    %71 = tpu.matmul %68, %70, %cst_55 {dimension_numbers = #tpu.dot_dimension_numbers<[1], [0], [0], [1], [0, 0, 1, 1], [], []>} : vector<8x32xf32>, vector<32x32xf32>, vector<8x32xf32> -> vector<8x32xf32>
    %c1_56 = arith.constant 1 : index
    %c0_57 = arith.constant 0 : index
    %c0_58 = arith.constant 0 : index
    %72 = vector.load %arg11[%c1_56, %c0_57, %c0_58] : memref<4x32x32xf32, #tpu.memory_space<vmem>>, vector<1x32x32xf32>
    %73 = vector.shape_cast %72 : vector<1x32x32xf32> to vector<32x32xf32>
    %cst_59 = arith.constant dense<0.000000e+00> : vector<8x32xf32>
    %74 = tpu.matmul %68, %73, %cst_59 {dimension_numbers = #tpu.dot_dimension_numbers<[1], [0], [0], [1], [0, 0, 1, 1], [], []>} : vector<8x32xf32>, vector<32x32xf32>, vector<8x32xf32> -> vector<8x32xf32>
    %75 = arith.truncf %71 : vector<8x32xf32> to vector<8x32xbf16>
    %cst_60 = arith.constant dense<0.000000e+00> : vector<56x32xf32>
    %76 = tpu.matmul %0, %75, %cst_60 {dimension_numbers = #tpu.dot_dimension_numbers<[1], [0], [0], [1], [0, 0, 1, 1], [], []>} : vector<56x8xbf16>, vector<8x32xbf16>, vector<56x32xf32> -> vector<56x32xf32>
    %77 = arith.truncf %74 : vector<8x32xf32> to vector<8x32xbf16>
    %cst_61 = arith.constant dense<0.000000e+00> : vector<56x32xf32>
    %78 = tpu.matmul %1, %77, %cst_61 {dimension_numbers = #tpu.dot_dimension_numbers<[1], [0], [0], [1], [0, 0, 1, 1], [], []>} : vector<56x8xbf16>, vector<8x32xbf16>, vector<56x32xf32> -> vector<56x32xf32>
    %79 = arith.addf %76, %78 : vector<56x32xf32>
    %c1_62 = arith.constant 1 : index
    %c0_63 = arith.constant 0 : index
    %c0_64 = arith.constant 0 : index
    %80 = vector.load %arg4[%c1_62, %c0_63, %c0_64] : memref<4x56x32xf32, #tpu.memory_space<vmem>>, vector<1x56x32xf32>
    %81 = vector.shape_cast %80 : vector<1x56x32xf32> to vector<56x32xf32>
    %82 = arith.addf %79, %81 : vector<56x32xf32>
    %83 = arith.negf %82 : vector<56x32xf32>
    %84 = math.exp %83 : vector<56x32xf32>
    %cst_65 = arith.constant 1.000000e+00 : f32
    %85 = vector.broadcast %cst_65 : f32 to vector<56x32xf32>
    %86 = arith.addf %85, %84 : vector<56x32xf32>
    %87 = arith.divf %85, %86 : vector<56x32xf32>
    %88 = arith.mulf %82, %87 : vector<56x32xf32>
    %c1_66 = arith.constant 1 : index
    %c0_67 = arith.constant 0 : index
    %c0_68 = arith.constant 0 : index
    %89 = vector.load %arg12[%c1_66, %c0_67, %c0_68] : memref<4x32x32xf32, #tpu.memory_space<vmem>>, vector<1x32x32xf32>
    %90 = vector.shape_cast %89 : vector<1x32x32xf32> to vector<32x32xf32>
    %cst_69 = arith.constant dense<0.000000e+00> : vector<56x32xf32>
    %91 = tpu.matmul %88, %90, %cst_69 {dimension_numbers = #tpu.dot_dimension_numbers<[1], [0], [0], [1], [0, 0, 1, 1], [], []>} : vector<56x32xf32>, vector<32x32xf32>, vector<56x32xf32> -> vector<56x32xf32>
    %c1_70 = arith.constant 1 : index
    %c0_71 = arith.constant 0 : index
    %c0_72 = arith.constant 0 : index
    %92 = vector.load %arg13[%c1_70, %c0_71, %c0_72] : memref<4x1x32xf32, #tpu.memory_space<vmem>>, vector<1x1x32xf32>
    %93 = vector.shape_cast %92 : vector<1x1x32xf32> to vector<1x32xf32>
    %94 = vector.broadcast %93 : vector<1x32xf32> to vector<56x32xf32>
    %95 = arith.addf %91, %94 : vector<56x32xf32>
    %96 = arith.negf %95 : vector<56x32xf32>
    %97 = math.exp %96 : vector<56x32xf32>
    %cst_73 = arith.constant 1.000000e+00 : f32
    %98 = vector.broadcast %cst_73 : f32 to vector<56x32xf32>
    %99 = arith.addf %98, %97 : vector<56x32xf32>
    %100 = arith.divf %98, %99 : vector<56x32xf32>
    %101 = arith.mulf %95, %100 : vector<56x32xf32>
    %102 = arith.truncf %101 : vector<56x32xf32> to vector<56x32xbf16>
    %cst_74 = arith.constant dense<0.000000e+00> : vector<8x32xf32>
    %103 = tpu.matmul %2, %102, %cst_74 {dimension_numbers = #tpu.dot_dimension_numbers<[1], [0], [0], [1], [0, 0, 1, 1], [], []>} : vector<8x56xbf16>, vector<56x32xbf16>, vector<8x32xf32> -> vector<8x32xf32>
    %c1_75 = arith.constant 1 : index
    %c0_76 = arith.constant 0 : index
    %c0_77 = arith.constant 0 : index
    %104 = vector.load %arg14[%c1_75, %c0_76, %c0_77] : memref<4x32x32xf32, #tpu.memory_space<vmem>>, vector<1x32x32xf32>
    %105 = vector.shape_cast %104 : vector<1x32x32xf32> to vector<32x32xf32>
    %cst_78 = arith.constant dense<0.000000e+00> : vector<8x32xf32>
    %106 = tpu.matmul %68, %105, %cst_78 {dimension_numbers = #tpu.dot_dimension_numbers<[1], [0], [0], [1], [0, 0, 1, 1], [], []>} : vector<8x32xf32>, vector<32x32xf32>, vector<8x32xf32> -> vector<8x32xf32>
    %c1_79 = arith.constant 1 : index
    %c0_80 = arith.constant 0 : index
    %c0_81 = arith.constant 0 : index
    %107 = vector.load %arg15[%c1_79, %c0_80, %c0_81] : memref<4x32x32xf32, #tpu.memory_space<vmem>>, vector<1x32x32xf32>
    %108 = vector.shape_cast %107 : vector<1x32x32xf32> to vector<32x32xf32>
    %cst_82 = arith.constant dense<0.000000e+00> : vector<8x32xf32>
    %109 = tpu.matmul %103, %108, %cst_82 {dimension_numbers = #tpu.dot_dimension_numbers<[1], [0], [0], [1], [0, 0, 1, 1], [], []>} : vector<8x32xf32>, vector<32x32xf32>, vector<8x32xf32> -> vector<8x32xf32>
    %110 = arith.addf %106, %109 : vector<8x32xf32>
    %c1_83 = arith.constant 1 : index
    %c0_84 = arith.constant 0 : index
    %c0_85 = arith.constant 0 : index
    %111 = vector.load %arg16[%c1_83, %c0_84, %c0_85] : memref<4x1x32xf32, #tpu.memory_space<vmem>>, vector<1x1x32xf32>
    %112 = vector.shape_cast %111 : vector<1x1x32xf32> to vector<1x32xf32>
    %113 = vector.broadcast %112 : vector<1x32xf32> to vector<8x32xf32>
    %114 = arith.addf %110, %113 : vector<8x32xf32>
    %115 = arith.negf %114 : vector<8x32xf32>
    %116 = math.exp %115 : vector<8x32xf32>
    %cst_86 = arith.constant 1.000000e+00 : f32
    %117 = vector.broadcast %cst_86 : f32 to vector<8x32xf32>
    %118 = arith.addf %117, %116 : vector<8x32xf32>
    %119 = arith.divf %117, %118 : vector<8x32xf32>
    %120 = arith.mulf %114, %119 : vector<8x32xf32>
    %c1_87 = arith.constant 1 : index
    %c0_88 = arith.constant 0 : index
    %c0_89 = arith.constant 0 : index
    %121 = vector.load %arg17[%c1_87, %c0_88, %c0_89] : memref<4x32x32xf32, #tpu.memory_space<vmem>>, vector<1x32x32xf32>
    %122 = vector.shape_cast %121 : vector<1x32x32xf32> to vector<32x32xf32>
    %cst_90 = arith.constant dense<0.000000e+00> : vector<8x32xf32>
    %123 = tpu.matmul %120, %122, %cst_90 {dimension_numbers = #tpu.dot_dimension_numbers<[1], [0], [0], [1], [0, 0, 1, 1], [], []>} : vector<8x32xf32>, vector<32x32xf32>, vector<8x32xf32> -> vector<8x32xf32>
    %c1_91 = arith.constant 1 : index
    %c0_92 = arith.constant 0 : index
    %c0_93 = arith.constant 0 : index
    %124 = vector.load %arg18[%c1_91, %c0_92, %c0_93] : memref<4x1x32xf32, #tpu.memory_space<vmem>>, vector<1x1x32xf32>
    %125 = vector.shape_cast %124 : vector<1x1x32xf32> to vector<1x32xf32>
    %126 = vector.broadcast %125 : vector<1x32xf32> to vector<8x32xf32>
    %127 = arith.addf %123, %126 : vector<8x32xf32>
    %128 = arith.addf %68, %127 : vector<8x32xf32>
    %c2 = arith.constant 2 : index
    %c0_94 = arith.constant 0 : index
    %c0_95 = arith.constant 0 : index
    %129 = vector.load %arg10[%c2, %c0_94, %c0_95] : memref<4x32x32xf32, #tpu.memory_space<vmem>>, vector<1x32x32xf32>
    %130 = vector.shape_cast %129 : vector<1x32x32xf32> to vector<32x32xf32>
    %cst_96 = arith.constant dense<0.000000e+00> : vector<8x32xf32>
    %131 = tpu.matmul %128, %130, %cst_96 {dimension_numbers = #tpu.dot_dimension_numbers<[1], [0], [0], [1], [0, 0, 1, 1], [], []>} : vector<8x32xf32>, vector<32x32xf32>, vector<8x32xf32> -> vector<8x32xf32>
    %c2_97 = arith.constant 2 : index
    %c0_98 = arith.constant 0 : index
    %c0_99 = arith.constant 0 : index
    %132 = vector.load %arg11[%c2_97, %c0_98, %c0_99] : memref<4x32x32xf32, #tpu.memory_space<vmem>>, vector<1x32x32xf32>
    %133 = vector.shape_cast %132 : vector<1x32x32xf32> to vector<32x32xf32>
    %cst_100 = arith.constant dense<0.000000e+00> : vector<8x32xf32>
    %134 = tpu.matmul %128, %133, %cst_100 {dimension_numbers = #tpu.dot_dimension_numbers<[1], [0], [0], [1], [0, 0, 1, 1], [], []>} : vector<8x32xf32>, vector<32x32xf32>, vector<8x32xf32> -> vector<8x32xf32>
    %135 = arith.truncf %131 : vector<8x32xf32> to vector<8x32xbf16>
    %cst_101 = arith.constant dense<0.000000e+00> : vector<56x32xf32>
    %136 = tpu.matmul %0, %135, %cst_101 {dimension_numbers = #tpu.dot_dimension_numbers<[1], [0], [0], [1], [0, 0, 1, 1], [], []>} : vector<56x8xbf16>, vector<8x32xbf16>, vector<56x32xf32> -> vector<56x32xf32>
    %137 = arith.truncf %134 : vector<8x32xf32> to vector<8x32xbf16>
    %cst_102 = arith.constant dense<0.000000e+00> : vector<56x32xf32>
    %138 = tpu.matmul %1, %137, %cst_102 {dimension_numbers = #tpu.dot_dimension_numbers<[1], [0], [0], [1], [0, 0, 1, 1], [], []>} : vector<56x8xbf16>, vector<8x32xbf16>, vector<56x32xf32> -> vector<56x32xf32>
    %139 = arith.addf %136, %138 : vector<56x32xf32>
    %c2_103 = arith.constant 2 : index
    %c0_104 = arith.constant 0 : index
    %c0_105 = arith.constant 0 : index
    %140 = vector.load %arg4[%c2_103, %c0_104, %c0_105] : memref<4x56x32xf32, #tpu.memory_space<vmem>>, vector<1x56x32xf32>
    %141 = vector.shape_cast %140 : vector<1x56x32xf32> to vector<56x32xf32>
    %142 = arith.addf %139, %141 : vector<56x32xf32>
    %143 = arith.negf %142 : vector<56x32xf32>
    %144 = math.exp %143 : vector<56x32xf32>
    %cst_106 = arith.constant 1.000000e+00 : f32
    %145 = vector.broadcast %cst_106 : f32 to vector<56x32xf32>
    %146 = arith.addf %145, %144 : vector<56x32xf32>
    %147 = arith.divf %145, %146 : vector<56x32xf32>
    %148 = arith.mulf %142, %147 : vector<56x32xf32>
    %c2_107 = arith.constant 2 : index
    %c0_108 = arith.constant 0 : index
    %c0_109 = arith.constant 0 : index
    %149 = vector.load %arg12[%c2_107, %c0_108, %c0_109] : memref<4x32x32xf32, #tpu.memory_space<vmem>>, vector<1x32x32xf32>
    %150 = vector.shape_cast %149 : vector<1x32x32xf32> to vector<32x32xf32>
    %cst_110 = arith.constant dense<0.000000e+00> : vector<56x32xf32>
    %151 = tpu.matmul %148, %150, %cst_110 {dimension_numbers = #tpu.dot_dimension_numbers<[1], [0], [0], [1], [0, 0, 1, 1], [], []>} : vector<56x32xf32>, vector<32x32xf32>, vector<56x32xf32> -> vector<56x32xf32>
    %c2_111 = arith.constant 2 : index
    %c0_112 = arith.constant 0 : index
    %c0_113 = arith.constant 0 : index
    %152 = vector.load %arg13[%c2_111, %c0_112, %c0_113] : memref<4x1x32xf32, #tpu.memory_space<vmem>>, vector<1x1x32xf32>
    %153 = vector.shape_cast %152 : vector<1x1x32xf32> to vector<1x32xf32>
    %154 = vector.broadcast %153 : vector<1x32xf32> to vector<56x32xf32>
    %155 = arith.addf %151, %154 : vector<56x32xf32>
    %156 = arith.negf %155 : vector<56x32xf32>
    %157 = math.exp %156 : vector<56x32xf32>
    %cst_114 = arith.constant 1.000000e+00 : f32
    %158 = vector.broadcast %cst_114 : f32 to vector<56x32xf32>
    %159 = arith.addf %158, %157 : vector<56x32xf32>
    %160 = arith.divf %158, %159 : vector<56x32xf32>
    %161 = arith.mulf %155, %160 : vector<56x32xf32>
    %162 = arith.truncf %161 : vector<56x32xf32> to vector<56x32xbf16>
    %cst_115 = arith.constant dense<0.000000e+00> : vector<8x32xf32>
    %163 = tpu.matmul %2, %162, %cst_115 {dimension_numbers = #tpu.dot_dimension_numbers<[1], [0], [0], [1], [0, 0, 1, 1], [], []>} : vector<8x56xbf16>, vector<56x32xbf16>, vector<8x32xf32> -> vector<8x32xf32>
    %c2_116 = arith.constant 2 : index
    %c0_117 = arith.constant 0 : index
    %c0_118 = arith.constant 0 : index
    %164 = vector.load %arg14[%c2_116, %c0_117, %c0_118] : memref<4x32x32xf32, #tpu.memory_space<vmem>>, vector<1x32x32xf32>
    %165 = vector.shape_cast %164 : vector<1x32x32xf32> to vector<32x32xf32>
    %cst_119 = arith.constant dense<0.000000e+00> : vector<8x32xf32>
    %166 = tpu.matmul %128, %165, %cst_119 {dimension_numbers = #tpu.dot_dimension_numbers<[1], [0], [0], [1], [0, 0, 1, 1], [], []>} : vector<8x32xf32>, vector<32x32xf32>, vector<8x32xf32> -> vector<8x32xf32>
    %c2_120 = arith.constant 2 : index
    %c0_121 = arith.constant 0 : index
    %c0_122 = arith.constant 0 : index
    %167 = vector.load %arg15[%c2_120, %c0_121, %c0_122] : memref<4x32x32xf32, #tpu.memory_space<vmem>>, vector<1x32x32xf32>
    %168 = vector.shape_cast %167 : vector<1x32x32xf32> to vector<32x32xf32>
    %cst_123 = arith.constant dense<0.000000e+00> : vector<8x32xf32>
    %169 = tpu.matmul %163, %168, %cst_123 {dimension_numbers = #tpu.dot_dimension_numbers<[1], [0], [0], [1], [0, 0, 1, 1], [], []>} : vector<8x32xf32>, vector<32x32xf32>, vector<8x32xf32> -> vector<8x32xf32>
    %170 = arith.addf %166, %169 : vector<8x32xf32>
    %c2_124 = arith.constant 2 : index
    %c0_125 = arith.constant 0 : index
    %c0_126 = arith.constant 0 : index
    %171 = vector.load %arg16[%c2_124, %c0_125, %c0_126] : memref<4x1x32xf32, #tpu.memory_space<vmem>>, vector<1x1x32xf32>
    %172 = vector.shape_cast %171 : vector<1x1x32xf32> to vector<1x32xf32>
    %173 = vector.broadcast %172 : vector<1x32xf32> to vector<8x32xf32>
    %174 = arith.addf %170, %173 : vector<8x32xf32>
    %175 = arith.negf %174 : vector<8x32xf32>
    %176 = math.exp %175 : vector<8x32xf32>
    %cst_127 = arith.constant 1.000000e+00 : f32
    %177 = vector.broadcast %cst_127 : f32 to vector<8x32xf32>
    %178 = arith.addf %177, %176 : vector<8x32xf32>
    %179 = arith.divf %177, %178 : vector<8x32xf32>
    %180 = arith.mulf %174, %179 : vector<8x32xf32>
    %c2_128 = arith.constant 2 : index
    %c0_129 = arith.constant 0 : index
    %c0_130 = arith.constant 0 : index
    %181 = vector.load %arg17[%c2_128, %c0_129, %c0_130] : memref<4x32x32xf32, #tpu.memory_space<vmem>>, vector<1x32x32xf32>
    %182 = vector.shape_cast %181 : vector<1x32x32xf32> to vector<32x32xf32>
    %cst_131 = arith.constant dense<0.000000e+00> : vector<8x32xf32>
    %183 = tpu.matmul %180, %182, %cst_131 {dimension_numbers = #tpu.dot_dimension_numbers<[1], [0], [0], [1], [0, 0, 1, 1], [], []>} : vector<8x32xf32>, vector<32x32xf32>, vector<8x32xf32> -> vector<8x32xf32>
    %c2_132 = arith.constant 2 : index
    %c0_133 = arith.constant 0 : index
    %c0_134 = arith.constant 0 : index
    %184 = vector.load %arg18[%c2_132, %c0_133, %c0_134] : memref<4x1x32xf32, #tpu.memory_space<vmem>>, vector<1x1x32xf32>
    %185 = vector.shape_cast %184 : vector<1x1x32xf32> to vector<1x32xf32>
    %186 = vector.broadcast %185 : vector<1x32xf32> to vector<8x32xf32>
    %187 = arith.addf %183, %186 : vector<8x32xf32>
    %188 = arith.addf %128, %187 : vector<8x32xf32>
    %c3 = arith.constant 3 : index
    %c0_135 = arith.constant 0 : index
    %c0_136 = arith.constant 0 : index
    %189 = vector.load %arg10[%c3, %c0_135, %c0_136] : memref<4x32x32xf32, #tpu.memory_space<vmem>>, vector<1x32x32xf32>
    %190 = vector.shape_cast %189 : vector<1x32x32xf32> to vector<32x32xf32>
    %cst_137 = arith.constant dense<0.000000e+00> : vector<8x32xf32>
    %191 = tpu.matmul %188, %190, %cst_137 {dimension_numbers = #tpu.dot_dimension_numbers<[1], [0], [0], [1], [0, 0, 1, 1], [], []>} : vector<8x32xf32>, vector<32x32xf32>, vector<8x32xf32> -> vector<8x32xf32>
    %c3_138 = arith.constant 3 : index
    %c0_139 = arith.constant 0 : index
    %c0_140 = arith.constant 0 : index
    %192 = vector.load %arg11[%c3_138, %c0_139, %c0_140] : memref<4x32x32xf32, #tpu.memory_space<vmem>>, vector<1x32x32xf32>
    %193 = vector.shape_cast %192 : vector<1x32x32xf32> to vector<32x32xf32>
    %cst_141 = arith.constant dense<0.000000e+00> : vector<8x32xf32>
    %194 = tpu.matmul %188, %193, %cst_141 {dimension_numbers = #tpu.dot_dimension_numbers<[1], [0], [0], [1], [0, 0, 1, 1], [], []>} : vector<8x32xf32>, vector<32x32xf32>, vector<8x32xf32> -> vector<8x32xf32>
    %195 = arith.truncf %191 : vector<8x32xf32> to vector<8x32xbf16>
    %cst_142 = arith.constant dense<0.000000e+00> : vector<56x32xf32>
    %196 = tpu.matmul %0, %195, %cst_142 {dimension_numbers = #tpu.dot_dimension_numbers<[1], [0], [0], [1], [0, 0, 1, 1], [], []>} : vector<56x8xbf16>, vector<8x32xbf16>, vector<56x32xf32> -> vector<56x32xf32>
    %197 = arith.truncf %194 : vector<8x32xf32> to vector<8x32xbf16>
    %cst_143 = arith.constant dense<0.000000e+00> : vector<56x32xf32>
    %198 = tpu.matmul %1, %197, %cst_143 {dimension_numbers = #tpu.dot_dimension_numbers<[1], [0], [0], [1], [0, 0, 1, 1], [], []>} : vector<56x8xbf16>, vector<8x32xbf16>, vector<56x32xf32> -> vector<56x32xf32>
    %199 = arith.addf %196, %198 : vector<56x32xf32>
    %c3_144 = arith.constant 3 : index
    %c0_145 = arith.constant 0 : index
    %c0_146 = arith.constant 0 : index
    %200 = vector.load %arg4[%c3_144, %c0_145, %c0_146] : memref<4x56x32xf32, #tpu.memory_space<vmem>>, vector<1x56x32xf32>
    %201 = vector.shape_cast %200 : vector<1x56x32xf32> to vector<56x32xf32>
    %202 = arith.addf %199, %201 : vector<56x32xf32>
    %203 = arith.negf %202 : vector<56x32xf32>
    %204 = math.exp %203 : vector<56x32xf32>
    %cst_147 = arith.constant 1.000000e+00 : f32
    %205 = vector.broadcast %cst_147 : f32 to vector<56x32xf32>
    %206 = arith.addf %205, %204 : vector<56x32xf32>
    %207 = arith.divf %205, %206 : vector<56x32xf32>
    %208 = arith.mulf %202, %207 : vector<56x32xf32>
    %c3_148 = arith.constant 3 : index
    %c0_149 = arith.constant 0 : index
    %c0_150 = arith.constant 0 : index
    %209 = vector.load %arg12[%c3_148, %c0_149, %c0_150] : memref<4x32x32xf32, #tpu.memory_space<vmem>>, vector<1x32x32xf32>
    %210 = vector.shape_cast %209 : vector<1x32x32xf32> to vector<32x32xf32>
    %cst_151 = arith.constant dense<0.000000e+00> : vector<56x32xf32>
    %211 = tpu.matmul %208, %210, %cst_151 {dimension_numbers = #tpu.dot_dimension_numbers<[1], [0], [0], [1], [0, 0, 1, 1], [], []>} : vector<56x32xf32>, vector<32x32xf32>, vector<56x32xf32> -> vector<56x32xf32>
    %c3_152 = arith.constant 3 : index
    %c0_153 = arith.constant 0 : index
    %c0_154 = arith.constant 0 : index
    %212 = vector.load %arg13[%c3_152, %c0_153, %c0_154] : memref<4x1x32xf32, #tpu.memory_space<vmem>>, vector<1x1x32xf32>
    %213 = vector.shape_cast %212 : vector<1x1x32xf32> to vector<1x32xf32>
    %214 = vector.broadcast %213 : vector<1x32xf32> to vector<56x32xf32>
    %215 = arith.addf %211, %214 : vector<56x32xf32>
    %216 = arith.negf %215 : vector<56x32xf32>
    %217 = math.exp %216 : vector<56x32xf32>
    %cst_155 = arith.constant 1.000000e+00 : f32
    %218 = vector.broadcast %cst_155 : f32 to vector<56x32xf32>
    %219 = arith.addf %218, %217 : vector<56x32xf32>
    %220 = arith.divf %218, %219 : vector<56x32xf32>
    %221 = arith.mulf %215, %220 : vector<56x32xf32>
    %222 = arith.truncf %221 : vector<56x32xf32> to vector<56x32xbf16>
    %cst_156 = arith.constant dense<0.000000e+00> : vector<8x32xf32>
    %223 = tpu.matmul %2, %222, %cst_156 {dimension_numbers = #tpu.dot_dimension_numbers<[1], [0], [0], [1], [0, 0, 1, 1], [], []>} : vector<8x56xbf16>, vector<56x32xbf16>, vector<8x32xf32> -> vector<8x32xf32>
    %c3_157 = arith.constant 3 : index
    %c0_158 = arith.constant 0 : index
    %c0_159 = arith.constant 0 : index
    %224 = vector.load %arg14[%c3_157, %c0_158, %c0_159] : memref<4x32x32xf32, #tpu.memory_space<vmem>>, vector<1x32x32xf32>
    %225 = vector.shape_cast %224 : vector<1x32x32xf32> to vector<32x32xf32>
    %cst_160 = arith.constant dense<0.000000e+00> : vector<8x32xf32>
    %226 = tpu.matmul %188, %225, %cst_160 {dimension_numbers = #tpu.dot_dimension_numbers<[1], [0], [0], [1], [0, 0, 1, 1], [], []>} : vector<8x32xf32>, vector<32x32xf32>, vector<8x32xf32> -> vector<8x32xf32>
    %c3_161 = arith.constant 3 : index
    %c0_162 = arith.constant 0 : index
    %c0_163 = arith.constant 0 : index
    %227 = vector.load %arg15[%c3_161, %c0_162, %c0_163] : memref<4x32x32xf32, #tpu.memory_space<vmem>>, vector<1x32x32xf32>
    %228 = vector.shape_cast %227 : vector<1x32x32xf32> to vector<32x32xf32>
    %cst_164 = arith.constant dense<0.000000e+00> : vector<8x32xf32>
    %229 = tpu.matmul %223, %228, %cst_164 {dimension_numbers = #tpu.dot_dimension_numbers<[1], [0], [0], [1], [0, 0, 1, 1], [], []>} : vector<8x32xf32>, vector<32x32xf32>, vector<8x32xf32> -> vector<8x32xf32>
    %230 = arith.addf %226, %229 : vector<8x32xf32>
    %c3_165 = arith.constant 3 : index
    %c0_166 = arith.constant 0 : index
    %c0_167 = arith.constant 0 : index
    %231 = vector.load %arg16[%c3_165, %c0_166, %c0_167] : memref<4x1x32xf32, #tpu.memory_space<vmem>>, vector<1x1x32xf32>
    %232 = vector.shape_cast %231 : vector<1x1x32xf32> to vector<1x32xf32>
    %233 = vector.broadcast %232 : vector<1x32xf32> to vector<8x32xf32>
    %234 = arith.addf %230, %233 : vector<8x32xf32>
    %235 = arith.negf %234 : vector<8x32xf32>
    %236 = math.exp %235 : vector<8x32xf32>
    %cst_168 = arith.constant 1.000000e+00 : f32
    %237 = vector.broadcast %cst_168 : f32 to vector<8x32xf32>
    %238 = arith.addf %237, %236 : vector<8x32xf32>
    %239 = arith.divf %237, %238 : vector<8x32xf32>
    %240 = arith.mulf %234, %239 : vector<8x32xf32>
    %c3_169 = arith.constant 3 : index
    %c0_170 = arith.constant 0 : index
    %c0_171 = arith.constant 0 : index
    %241 = vector.load %arg17[%c3_169, %c0_170, %c0_171] : memref<4x32x32xf32, #tpu.memory_space<vmem>>, vector<1x32x32xf32>
    %242 = vector.shape_cast %241 : vector<1x32x32xf32> to vector<32x32xf32>
    %cst_172 = arith.constant dense<0.000000e+00> : vector<8x32xf32>
    %243 = tpu.matmul %240, %242, %cst_172 {dimension_numbers = #tpu.dot_dimension_numbers<[1], [0], [0], [1], [0, 0, 1, 1], [], []>} : vector<8x32xf32>, vector<32x32xf32>, vector<8x32xf32> -> vector<8x32xf32>
    %c3_173 = arith.constant 3 : index
    %c0_174 = arith.constant 0 : index
    %c0_175 = arith.constant 0 : index
    %244 = vector.load %arg18[%c3_173, %c0_174, %c0_175] : memref<4x1x32xf32, #tpu.memory_space<vmem>>, vector<1x1x32xf32>
    %245 = vector.shape_cast %244 : vector<1x1x32xf32> to vector<1x32xf32>
    %246 = vector.broadcast %245 : vector<1x32xf32> to vector<8x32xf32>
    %247 = arith.addf %243, %246 : vector<8x32xf32>
    %248 = arith.addf %188, %247 : vector<8x32xf32>
    %c0_176 = arith.constant 0 : index
    %c0_177 = arith.constant 0 : index
    %249 = vector.load %arg8[%c0_176, %c0_177] : memref<32x4xf32, #tpu.memory_space<vmem>>, vector<32x4xf32>
    %cst_178 = arith.constant dense<0.000000e+00> : vector<8x4xf32>
    %250 = tpu.matmul %248, %249, %cst_178 {dimension_numbers = #tpu.dot_dimension_numbers<[1], [0], [0], [1], [0, 0, 1, 1], [], []>} : vector<8x32xf32>, vector<32x4xf32>, vector<8x4xf32> -> vector<8x4xf32>
    %c0_179 = arith.constant 0 : index
    %c0_180 = arith.constant 0 : index
    %251 = vector.load %arg9[%c0_179, %c0_180] : memref<1x4xf32, #tpu.memory_space<vmem>>, vector<1x4xf32>
    %252 = vector.broadcast %251 : vector<1x4xf32> to vector<8x4xf32>
    %253 = arith.addf %250, %252 : vector<8x4xf32>
    %c0_181 = arith.constant 0 : index
    %c0_182 = arith.constant 0 : index
    %254 = vector.load %arg19[%c0_181, %c0_182] : memref<8x4xf32, #tpu.memory_space<vmem>>, vector<8x4xf32>
    tpu.vector_store %arg19[%c0_181, %c0_182], %253 {strides = array<i32>} : memref<8x4xf32, #tpu.memory_space<vmem>>, vector<8x4xf32>,
    return
  }
}

</mosaic_0001>

<bundles_post_ra>
// kernel: tpu_custom_call.1
= control target key start
LH: loop header
LB: loop body
LE: loop exit
PB: predicated region body
PF: predicated region fallthrough
CT: control target
= control target key end

     0   :  { %s6129_s0 = inlined_call_operand.vmem [shape: f32[8,4], index: 0, kind: input, shape index: {}]   ;;  %s6130_s1 = inlined_call_operand.vmem [shape: bf16[56,8], index: 1, kind: input, shape index: {}]   ;;  %s6131_s2 = inlined_call_operand.vmem [shape: bf16[56,8], index: 2, kind: input, shape index: {}]   ;;  %s6132_s3 = inlined_call_operand.vmem [shape: bf16[8,56], index: 3, kind: input, shape index: {}]   ;;  %s6133_s4 = inlined_call_operand.vmem [shape: f32[4,56,32], index: 4, kind: input, shape index: {}]   ;;  %s6134_s5 = inlined_call_operand.vmem [shape: f32[8,1], index: 5, kind: input, shape index: {}]   ;;  %s6135_s6 = inlined_call_operand.hbm [shape: f32[4,32], index: 6, kind: input, shape index: {}]   ;;  %s6136_s7 = inlined_call_operand.vmem [shape: f32[1,32], index: 7, kind: input, shape index: {}]   ;;  %s6137_s8 = inlined_call_operand.vmem [shape: f32[32,4], index: 8, kind: input, shape index: {}]   ;;  %s6138_s9 = inlined_call_operand.vmem [shape: f32[1,4], index: 9, kind: input, shape index: {}]   ;;  %s6139_s10 = inlined_call_operand.vmem [shape: f32[4,32,32], index: 10, kind: input, shape index: {}]   ;;  %s6140_s11 = inlined_call_operand.vmem [shape: f32[4,32,32], index: 11, kind: input, shape index: {}]   ;;  %s6141_s12 = inlined_call_operand.vmem [shape: f32[4,32,32], index: 12, kind: input, shape index: {}]   ;;  %s6142_s13 = inlined_call_operand.hbm [shape: f32[4,1,32], index: 13, kind: input, shape index: {}]   ;;  %s6143_s14 = inlined_call_operand.vmem [shape: f32[4,32,32], index: 14, kind: input, shape index: {}]   ;;  %s6144_s15 = inlined_call_operand.hbm [shape: f32[4,32,32], index: 15, kind: input, shape index: {}]   ;;  %s6145_s16 = inlined_call_operand.vmem [shape: f32[4,1,32], index: 16, kind: input, shape index: {}]   ;;  %s6146_s17 = inlined_call_operand.hbm [shape: f32[4,32,32], index: 17, kind: input, shape index: {}]   ;;  %s6147_s18 = inlined_call_operand.vmem [shape: f32[4,1,32], index: 18, kind: input, shape index: {}]   ;;  %s6148_s19 = inlined_call_operand.vmem [shape: f32[8,4], index: 19, kind: output, shape index: {}]  }
   0x1   :  { %6152 = sst [smem:[#allocation12_spill]] %s6129_s0 }
   0x2   :  { %6153 = sst [smem:[#allocation13_spill]] %s6130_s1 }
   0x3   :  { %6154 = sst [smem:[#allocation14_spill]] %s6131_s2 }
   0x4   :  { %6155 = sst [smem:[#allocation15_spill]] %s6132_s3 }
   0x5   :  { %24 = vsyncpa [#allocation3], 0 }
   0x6   :  { %25 = vsyncpa [#allocation5], 0 }
   0x7   :  { %26 = vsyncpa [#allocation8], 0  ;;  %s5196_s29 = smov [#allocation4]   ;;  %s5102_s20 = scalar_lea.hbm %s6142_s13, 64 }
   0x8   :  { %s66_s0 = sshll.u32 %s5196_s29, 4  ;;  %p5103_p0 = scmp.ne.s32.totalorder %s6142_s13, %s5102_s20  ;;  %s67_s0 = int_to_ptr.vmem [resolvable:$true] %s66_s0 }
   0x9   :  { %p5106_p1 = scmp.lt.u32.totalorder %s5102_s20, %s6142_s13 }
   0xb   :  { %p5108_p2 = pnand %p5106_p1, %p5103_p0 }
   0xd   :  { %5111 = shalt.err (!%p5108_p2)
}
   0xe   :  { %s5112_s23 = scalar_lea.vmem %s67_s0, 64  ;;  %p5117_p4 = scmp.lt.s32.totalorder %s67_s0, %s67_s0 }
   0xf   :  { %p5113_p3 = scmp.ne.s32.totalorder %s67_s0, %s5112_s23  ;;  %p5118_p5 = scmp.lt.s32.totalorder %s5112_s23, %s5112_s23 }
  0x11   :  { %p5119_p6 = por %p5118_p5, %p5117_p4 }
  0x13   :  { %p5120_p7 = pnand %p5119_p6, %p5113_p3 }
  0x15   :  { %5123 = shalt.err (!%p5120_p7)
}
  0x16   :  { %s5197_s24 = smov 16   ;;  %s5198_s3 = smov 1  }
  0x17   :  { %72 = dma.hbm_to_vmem [thread:$0]  %s6142_s13, 64, %s67_s0, [#allocation5], %s5197_s24, %s5197_s24, %s5198_s3  }
  0x18   :  { %s5199_s27 = smov [#allocation2]   ;;  %s5200_s29 = smov [#allocation6]  }
  0x19   :  { %s45_s28 = sshll.u32 %s5199_s27, 4  ;;  %s80_s5 = sshll.u32 %s5200_s29, 4  ;;  %s46_s28 = int_to_ptr.vmem [resolvable:$true] %s45_s28  ;;  %s81_s5 = int_to_ptr.vmem [resolvable:$true] %s80_s5 }
  0x1a   :  { %s5124_s1 = scalar_lea.hbm %s6135_s6, 64 }
  0x1b   :  { %p5125_p8 = scmp.ne.s32.totalorder %s6135_s6, %s5124_s1  ;;  %p5128_p9 = scmp.lt.u32.totalorder %s5124_s1, %s6135_s6 }
  0x1d   :  { %p5130_p10 = pnand %p5128_p9, %p5125_p8 }
  0x1f   :  { %5133 = shalt.err (!%p5130_p10)
}
  0x20   :  { %s5134_s13 = scalar_lea.vmem %s46_s28, 64  ;;  %p5139_p12 = scmp.lt.s32.totalorder %s46_s28, %s46_s28 }
  0x21   :  { %p5135_p11 = scmp.ne.s32.totalorder %s46_s28, %s5134_s13  ;;  %p5140_p13 = scmp.lt.s32.totalorder %s5134_s13, %s5134_s13 }
  0x23   :  { %p5141_p0 = por %p5140_p13, %p5139_p12 }
  0x25   :  { %p5142_p1 = pnand %p5141_p0, %p5135_p11 }
  0x27   :  { %5145 = shalt.err (!%p5142_p1)
}
  0x28   :  { %48 = dma.hbm_to_vmem [thread:$0]  %s6135_s6, 64, %s46_s28, [#allocation3]  }
  0x29   :  { %s5146_s26 = scalar_lea.hbm %s6144_s15, 2048 }
  0x2a   :  { %p5147_p2 = scmp.ne.s32.totalorder %s6144_s15, %s5146_s26  ;;  %p5150_p3 = scmp.lt.u32.totalorder %s5146_s26, %s6144_s15 }
  0x2c   :  { %p5152_p4 = pnand %p5150_p3, %p5147_p2 }
  0x2e   :  { %5155 = shalt.err (!%p5152_p4)
}
  0x2f   :  { %s5156_s1 = scalar_lea.vmem %s81_s5, 2048  ;;  %p5161_p6 = scmp.lt.s32.totalorder %s81_s5, %s81_s5 }
  0x30   :  { %p5157_p5 = scmp.ne.s32.totalorder %s81_s5, %s5156_s1  ;;  %p5162_p7 = scmp.lt.s32.totalorder %s5156_s1, %s5156_s1 }
  0x32   :  { %p5163_p8 = por %p5162_p7, %p5161_p6 }
  0x34   :  { %p5164_p9 = pnand %p5163_p8, %p5157_p5 }
  0x36   :  { %5167 = shalt.err (!%p5164_p9)
}
  0x37   :  { %s5201_s6 = smov 128   ;;  %s5202_s28 = smov 8  }
  0x38   :  { %86 = dma.hbm_to_vmem [thread:$0]  %s6144_s15, 2048, %s81_s5, [#allocation5], %s5201_s6, %s5201_s6, %s5202_s28  }
  0x39   :  { %s5203_s22 = smov [#allocation7]   ;;  %s5168_s24 = scalar_lea.hbm %s6146_s17, 2048 }
  0x3a   :  { %s94_s23 = sshll.u32 %s5203_s22, 4  ;;  %p5169_p10 = scmp.ne.s32.totalorder %s6146_s17, %s5168_s24  ;;  %s95_s23 = int_to_ptr.vmem [resolvable:$true] %s94_s23 }
  0x3b   :  { %p5172_p11 = scmp.lt.u32.totalorder %s5168_s24, %s6146_s17 }
  0x3d   :  { %p5174_p12 = pnand %p5172_p11, %p5169_p10 }
  0x3f   :  { %5177 = shalt.err (!%p5174_p12)
}
  0x40   :  { %s5178_s29 = scalar_lea.vmem %s95_s23, 2048  ;;  %p5183_p0 = scmp.lt.s32.totalorder %s95_s23, %s95_s23 }
  0x41   :  { %p5179_p13 = scmp.ne.s32.totalorder %s95_s23, %s5178_s29  ;;  %p5184_p1 = scmp.lt.s32.totalorder %s5178_s29, %s5178_s29 }
  0x43   :  { %p5185_p2 = por %p5184_p1, %p5183_p0 }
  0x45   :  { %p5186_p3 = pnand %p5185_p2, %p5179_p13 }
  0x47   :  { %5189 = shalt.err (!%p5186_p3)
}
  0x48   :  { %100 = dma.hbm_to_vmem [thread:$0]  %s6146_s17, 2048, %s95_s23, [#allocation8], %s5201_s6, %s5201_s6, %s5202_s28  }
  0x49   :  { %5190 = dma.done.wait [#allocation3], 64  }
  0x4a   :  { %5191 = vsyncadd [#allocation3], 4294967232 }
  0x4b   :  { %5192 = dma.done.wait [#allocation5], 2112  }
  0x4c   :  { %5193 = vsyncadd [#allocation5], 4294965184 }
  0x4d   :  { %5194 = dma.done.wait [#allocation8], 2048  }
  0x4e   :  { %5195 = vsyncadd [#allocation8], 4294965248  ;;  %v5204_v0 = vmov 0.0   ;;  %vm5205_vm0 = vmmov 0   ;;  %v5206_v1 = vmov 0.0|0.0   ;;  %vm144_vm1 = vcmask 1043456  }
  0x4f   :  { %4177 = vmatprep.subr.mxu1 %v5204_v0  ;;  %4179 = vmatprep.mubr.msk.f32.mxu1 %vm5205_vm0, %v5204_v0  ;;  %vm140_vm2 = vcmask 31744   ;;  %v132_v2 = vld [vmem:[#allocation2] sm:$0xf]  ;;  %s6156_s20 = sld [smem:[#allocation12_spill]]  ;;  %v218_v4 = vld [vmem:[%s6139_s10] sm:$0xff]  ;;  %v219_v5 = vld [vmem:[%s6139_s10 + $0x8] sm:$0xff] }
  0x50   :  { %4663 = vmatprep.subr.bf16.mxu0 %v5206_v1  ;;  %4201 = vmatprep.mubr.msk.f32.mxu0 %vm5205_vm0, %v5204_v0  ;;  %v296_v6 = vld [vmem:[%s6140_s11] sm:$0xff]  ;;  %v297_v7 = vld [vmem:[%s6140_s11 + $0x8] sm:$0xff]  ;;  %v4658_v8 = vpack.c.bf16 %v219_v5, %v218_v4  ;;  %v220_v10 = vld [vmem:[%s6139_s10 + $0x10] sm:$0xff]  ;;  %vm222_vm3 = vcmask 261120   ;;  %s6157_s1 = sld [smem:[#allocation14_spill]]  ;;  %vm390_vm4 = vcmask 64512  }
  0x51   :  { %4178 = vmatpush3.msk.msra.mxu1 %vm144_vm1, %v132_v2  ;;  %v4664_v9 = vpack.c.bf16 %v297_v7, %v296_v6  ;;  %v221_v11 = vld [vmem:[%s6139_s10 + $0x18] sm:$0xff]  ;;  %v298_v12 = vld [vmem:[%s6140_s11 + $0x10] sm:$0xff]  ;;  %v3722_v16 = vld [vmem:[%s6136_s7] ss:$0 sm:$0xff]  ;;  %s6158_s0 = sld [smem:[#allocation13_spill]]  ;;  %s6159_s2 = sld [smem:[#allocation15_spill]] }
  0x52   :  { %4657 = vmatprep.subr.bf16.mxu1 %v5206_v1  ;;  %v4661_v13 = vpack.c.bf16 %v221_v11, %v220_v10  ;;  %v299_v14 = vld [vmem:[%s6140_s11 + $0x18] sm:$0xff]  ;;  %v630_v36 = vld [vmem:[%s6141_s12] sm:$0xff]  ;;  %v631_v37 = vld [vmem:[%s6141_s12 + $0x8] sm:$0xff]  ;;  %vm815_vm5 = vcmask 457728  }
  0x53   :  { %4665 = vmatpush3.bf16.msra.mxu0 %v4664_v9  ;;  %v4667_v15 = vpack.c.bf16 %v299_v14, %v298_v12  ;;  %v4670_v38 = vpack.c.bf16 %v631_v37, %v630_v36  ;;  %v632_v39 = vld [vmem:[%s6141_s12 + $0x10] sm:$0xff]  ;;  %v633_v40 = vld [vmem:[%s6141_s12 + $0x18] sm:$0xff]  ;;  %v567_v54 = vld [vmem:[%s6133_s4] sm:$0xff] }
  0x54   :  { %4666 = vmatprep.subr.bf16.mxu0 %v5206_v1  ;;  %v4673_v41 = vpack.c.bf16 %v633_v40, %v632_v39  ;;  %v569_v51 = vld [vmem:[%s6133_s4 + $0x10] sm:$0xff]  ;;  %v570_v59 = vld [vmem:[%s6133_s4 + $0x18] sm:$0xff]  ;;  %v568_v61 = vld [vmem:[%s6133_s4 + $0x8] sm:$0xff] }
  0x55   :  { %v131_v3 = vld [vmem:[%s6156_s20] sm:$0xff] }
  0x56   :  { %4180 = vmatmul.mubr.msk.f32.vlgmr.msra.gmra.mrb[0].mxu1 %vm140_vm2, %v131_v3  ;;  %v5407_v20 = vld [vmem:[%s6157_s1 + $0x10] sm:$0xff]   ;;  %v5414_v21 = vld [vmem:[%s6157_s1] sm:$0xff]   ;;  %v5424_v29 = vld [vmem:[%s6157_s1 + $0x18] ss:$0 sps:$4 sm:$0xff]  }
  0x57   :  { %4190 = vmatprep.mubr.msk.f32.mxu1 %vm5205_vm0, %v5204_v0  ;;  %4659 = vmatpush3.bf16.msra.mxu1 %v4658_v8  ;;  %v5429_v30 = vld [vmem:[%s6157_s1 + $0x8] sm:$0xff]   ;;  %v5434_v31 = vld [vmem:[%s6158_s0] sm:$0xff]   ;;  %v5456_v34 = vld [vmem:[%s6158_s0 + $0x10] sm:$0xff]  }
  0x58   :  { %4660 = vmatprep.subr.bf16.mxu1 %v5206_v1  ;;  %4668 = vmatpush3.bf16.msra.mxu0 %v4667_v15  ;;  %v5451_v33 = vld [vmem:[%s6158_s0 + $0x8] sm:$0xff]   ;;  %v5465_v35 = vld [vmem:[%s6158_s0 + $0x18] ss:$0 sps:$4 sm:$0xff]   ;;  %v571_v10 = vld [vmem:[%s6133_s4 + $0x20] sm:$0xff] }
  0x59   :  { %v572_v15 = vld [vmem:[%s6133_s4 + $0x28] sm:$0xff] }
  0x5b   :  { %4662 = vmatpush3.bf16.msra.mxu1 %v4661_v13 }
 0x129   :  { %v214_v17 = vpop.f32.mrb[0].mxu1 }
 0x12a   :  { %v5398_v18 = vadd.f32 %v3722_v16, %v214_v17  ;;  %v4181_v19 = vpop.f32.mrb[1].mxu1 }
 0x12c   :  { %4191 = vmatmul.mubr.msk.f32.vlgmr.msra.gmra.mrb[2].mxu1 %vm222_vm3, %v5398_v18  ;;  %4202 = vmatmul.mubr.msk.f32.vlgmr.msra.gmra.mrb[0].mxu0 %vm222_vm3, %v5398_v18 }
 0x12d   :  { %4210 = vmatprep.mubr.msk.bf16.mxu1 %vm390_vm4, %v5407_v20  ;;  %4206 = vmatprep.mubr.msk.bf16.mxu0 %vm390_vm4, %v5414_v21 }
 0x1ff   :  { %v292_v22 = vpop.f32.mrb[2].mxu1  ;;  %v366_v23 = vpop.f32.mrb[0].mxu0 }
 0x200   :  { %v371_v24 = vpack.c.bf16 %v366_v23, %v366_v23  ;;  %v4192_v25 = vpop.f32.mrb[3].mxu1  ;;  %v4203_v26 = vpop.f32.mrb[1].mxu0  ;;  %v370_v27 = vpack.c.bf16 %v292_v22, %v292_v22  ;;  %v573_v23 = vld [vmem:[%s6133_s4 + $0x30] sm:$0xff] }
 0x202   :  { %4825 = vmatprep.subr.msk.bf16.mxu0 %vm144_vm1, %v371_v24  ;;  %4826 = vmatprep.subr.msk.bf16.mxu1 %vm144_vm1, %v371_v24  ;;  %v404_v28 = vsel %vm144_vm1, %v371_v24, 0  ;;  %v501_v32 = vsel %vm144_vm1, %v370_v27, 0 }
 0x203   :  { %4205 = vmatpush3.bf16.msra.mxu0 %v404_v28  ;;  %4808 = vmatpush3.bf16.msra.mxu1 %v404_v28 }
 0x204   :  { %4827 = vmatprep.subr.msk.bf16.mxu1 %vm144_vm1, %v370_v27  ;;  %4669 = vmatprep.subr.bf16.mxu0 %v5206_v1 }
 0x206   :  { %4211 = vmatmul.mubr.msk.bf16.vlgmr.msra.gmra.mrb[4].mxu1 %vm390_vm4, %v5424_v29  ;;  %4207 = vmatmul.mubr.msk.bf16.vlgmr.msra.gmra.mrb[4].mxu0 %vm390_vm4, %v5429_v30 }
 0x207   :  { %4215 = vmatpush3.bf16.msra.mxu1 %v501_v32  ;;  %4216 = vmatprep.mubr.msk.bf16.mxu1 %vm390_vm4, %v5434_v31 }
 0x208   :  { %4232 = vmatprep.mubr.msk.f32.mxu0 %vm5205_vm0, %v5204_v0  ;;  %4253 = vmatprep.subr.bf16.mxu1 %v5204_v0 }
 0x209   :  { %4671 = vmatpush3.bf16.msra.mxu0 %v4670_v38 }
 0x20a   :  { %4672 = vmatprep.subr.bf16.mxu0 %v5206_v1 }
 0x20d   :  { %4674 = vmatpush3.bf16.msra.mxu0 %v4673_v41 }
 0x20e   :  { %4217 = vmatmul.mubr.msk.bf16.vlgmr.msra.gmra.mrb[8].mxu1 %vm390_vm4, %v5451_v33  ;;  %4675 = vmatprep.subr.bf16.mxu0 %v5206_v1 }
 0x20f   :  { %4220 = vmatprep.mubr.msk.bf16.mxu1 %vm390_vm4, %v5456_v34 }
 0x216   :  { %4221 = vmatmul.mubr.msk.bf16.gmra.mrb[12].mxu1 %vm390_vm4, %v5465_v35 }
 0x217   :  { %4261 = vmatprep.mubr.msk.bf16.mxu1 %vm5205_vm0, %v5204_v0 }
 0x2d9   :  { %v4212_v42 = vpop.f32.mrb[4].mxu1  ;;  %v4208_v43 = vpop.f32.mrb[4].mxu0 }
 0x2da   :  { %v456_v44 = vpop.f32.mrb[5].mxu1  ;;  %v440_v45 = vpop.f32.mrb[5].mxu0 }
 0x2db   :  { %v4213_v46 = vpop.f32.mrb[6].mxu1  ;;  %v4209_v47 = vpop.f32.mrb[6].mxu0 }
 0x2dc   :  { %v459_v48 = vpop.f32.mrb[7].mxu1  ;;  %v443_v49 = vpop.f32.mrb[7].mxu0 }
 0x2e1   :  { %v4218_v50 = vpop.f32.mrb[8].mxu1 }
 0x2e2   :  { %v546_v52 = vadd.f32 %v4218_v50, %v4208_v43  ;;  %v537_v53 = vpop.f32.mrb[9].mxu1 }
 0x2e3   :  { %v538_v55 = vadd.f32 %v537_v53, %v440_v45  ;;  %v4219_v56 = vpop.f32.mrb[10].mxu1 }
 0x2e4   :  { %v5491_v57 = vadd.f32 %v569_v51, %v546_v52  ;;  %v549_v58 = vadd.f32 %v4219_v56, %v4209_v47  ;;  %v540_v60 = vpop.f32.mrb[11].mxu1 }
 0x2e5   :  { %v574_v62 = vadd.f32 %v567_v54, %v538_v55  ;;  %v541_v63 = vadd.f32 %v540_v60, %v443_v49 }
 0x2e6   :  { %v3745_v2 = vmul.f32 -1.442695, %v5491_v57  ;;  %v577_v4 = vadd.f32 %v570_v59, %v549_v58 }
 0x2e7   :  { %v3743_v3 = vmul.f32 -1.442695, %v574_v62  ;;  %v575_v5 = vadd.f32 %v568_v61, %v541_v63  ;;  %v866_v61 = vld [vmem:[#allocation6] sm:$0xff]  ;;  %v868_v63 = vld [vmem:[#allocation6 + $0x10] sm:$0xff] }
 0x2e8   :  { %v3746_v11 = vmul.f32 -1.442695, %v577_v4 }
 0x2e9   :  { %4853 = vpow2.f32 %v3743_v3  ;;  %v3744_v6 = vmul.f32 -1.442695, %v575_v5  ;;  %v4222_v7 = vpop.f32.mrb[12].mxu1  ;;  %v869_v3 = vld [vmem:[#allocation6 + $0x18] sm:$0xff] }
 0x2ea   :  { %4855 = vpow2.f32 %v3745_v2  ;;  %v562_v8 = vadd.f32 %v4222_v7, %v4212_v42  ;;  %v553_v9 = vpop.f32.mrb[13].mxu1 }
 0x2eb   :  { %4857 = vpow2.f32 %v3744_v6  ;;  %v554_v12 = vadd.f32 %v553_v9, %v456_v44  ;;  %v4223_v13 = vpop.f32.mrb[14].mxu1 }
 0x2ec   :  { %v556_v14 = vpop.f32.mrb[15].mxu1  ;;  %4859 = vpow2.f32 %v3746_v11  ;;  %v580_v25 = vadd.f32 %v573_v23, %v562_v8 }
 0x2ed   :  { %v578_v16 = vadd.f32 %v571_v10, %v554_v12  ;;  %v557_v17 = vadd.f32 %v556_v14, %v459_v48 }
 0x2ee   :  { %v3749_v37 = vmul.f32 -1.442695, %v580_v25 }
 0x2ef   :  { %v3747_v19 = vmul.f32 -1.442695, %v578_v16  ;;  %v579_v22 = vadd.f32 %v572_v15, %v557_v17 }
 0x2f1   :  { %4861 = vpow2.f32 %v3747_v19  ;;  %v3748_v26 = vmul.f32 -1.442695, %v579_v22 }
 0x2f3   :  { %v4854_v24 = vpop.eup %4853 }
 0x2f4   :  { %v4856_v27 = vpop.eup %4855  ;;  %v602_v28 = vadd.f32 1.0, %v4854_v24 }
 0x2f5   :  { %v4858_v32 = vpop.eup %4857  ;;  %v604_v38 = vadd.f32 1.0, %v4856_v27 }
 0x2f6   :  { %4863 = vrcp.f32 %v602_v28  ;;  %v603_v36 = vadd.f32 1.0, %v4858_v32  ;;  %v4860_v39 = vpop.eup %4859 }
 0x2f7   :  { %4865 = vpow2.f32 %v3748_v26  ;;  %v605_v40 = vadd.f32 1.0, %v4860_v39 }
 0x2f8   :  { %4867 = vrcp.f32 %v603_v36 }
 0x2f9   :  { %4869 = vpow2.f32 %v3749_v37 }
 0x2fa   :  { %4871 = vrcp.f32 %v604_v38 }
 0x2fb   :  { %v4862_v41 = vpop.eup %4861  ;;  %4873 = vrcp.f32 %v605_v40 }
 0x2fc   :  { %v606_v43 = vadd.f32 1.0, %v4862_v41 }
 0x2fe   :  { %4875 = vrcp.f32 %v606_v43 }
 0x300   :  { %v4864_v42 = vpop.eup %4863 }
 0x301   :  { %v4866_v44 = vpop.eup %4865  ;;  %v623_v45 = vmul.f32 %v4864_v42, %v574_v62  ;;  %v867_v62 = vld [vmem:[#allocation6 + $0x8] sm:$0xff] }
 0x302   :  { %v4868_v46 = vpop.eup %4867  ;;  %v607_v47 = vadd.f32 1.0, %v4866_v44  ;;  %v4676_v2 = vpack.c.bf16 %v867_v62, %v866_v61 }
 0x303   :  { %4233 = vmatmul.mubr.msk.f32.vlgmr.msra.gmra.mrb[2].mxu0 %vm222_vm3, %v623_v45  ;;  %v4870_v48 = vpop.eup %4869  ;;  %v624_v49 = vmul.f32 %v4868_v46, %v575_v5  ;;  %v3750_v5 = vld [vmem:[#allocation4] ss:$0 sm:$0xff] }
 0x304   :  { %4235 = vmatprep.mubr.msk.f32.mxu0 %vm5205_vm0, %v5204_v0  ;;  %v4872_v50 = vpop.eup %4871  ;;  %v608_v51 = vadd.f32 1.0, %v4870_v48  ;;  %4877 = vrcp.f32 %v607_v47  ;;  %4677 = vmatpush3.bf16.msra.mxu0 %v4676_v2 }
 0x305   :  { %v625_v52 = vmul.f32 %v4872_v50, %v5491_v57  ;;  %v4874_v53 = vpop.eup %4873  ;;  %4678 = vmatprep.subr.bf16.mxu0 %v5206_v1 }
 0x306   :  { %4879 = vrcp.f32 %v608_v51  ;;  %v626_v54 = vmul.f32 %v4874_v53, %v577_v4  ;;  %v4679_v4 = vpack.c.bf16 %v869_v3, %v868_v63 }
 0x307   :  { %4236 = vmatmul.mubr.msk.f32.gmra.mrb[8].mxu0 %vm222_vm3, %v624_v49 }
 0x308   :  { %4238 = vmatprep.mubr.msk.f32.mxu0 %vm5205_vm0, %v5204_v0  ;;  %v4876_v55 = vpop.eup %4875  ;;  %4680 = vmatpush3.bf16.msra.mxu0 %v4679_v4 }
 0x309   :  { %v627_v56 = vmul.f32 %v4876_v55, %v578_v16  ;;  %4687 = vmatprep.subr.bf16.mxu0 %v5206_v1 }
 0x30b   :  { %4239 = vmatmul.mubr.msk.f32.gmra.mrb[10].mxu0 %vm222_vm3, %v625_v52 }
 0x30c   :  { %4241 = vmatprep.mubr.msk.f32.mxu0 %vm5205_vm0, %v5204_v0 }
 0x30e   :  { %v4878_v58 = vpop.eup %4877 }
 0x30f   :  { %4242 = vmatmul.mubr.msk.f32.gmra.mrb[12].mxu0 %vm222_vm3, %v626_v54  ;;  %v628_v57 = vmul.f32 %v4878_v58, %v579_v22 }
 0x310   :  { %4244 = vmatprep.mubr.msk.f32.mxu0 %vm5205_vm0, %v5204_v0  ;;  %v4880_v59 = vpop.eup %4879 }
 0x311   :  { %v629_v60 = vmul.f32 %v4880_v59, %v580_v25 }
 0x313   :  { %4245 = vmatmul.mubr.msk.f32.gmra.mrb[14].mxu0 %vm222_vm3, %v627_v56 }
 0x314   :  { %4247 = vmatprep.mubr.msk.f32.mxu0 %vm5205_vm0, %v5204_v0 }
 0x317   :  { %4248 = vmatmul.mubr.msk.f32.gmra.mrb[16].mxu0 %vm222_vm3, %v628_v57 }
 0x318   :  { %4250 = vmatprep.mubr.msk.f32.mxu0 %vm5205_vm0, %v5204_v0 }
 0x31b   :  { %4251 = vmatmul.mubr.msk.f32.gmra.mrb[18].mxu0 %vm222_vm3, %v629_v60 }
 0x31c   :  { %4273 = vmatprep.mubr.msk.f32.mxu0 %vm5205_vm0, %v5204_v0 }
 0x3d6   :  { %v728_v6 = vpop.f32.mrb[2].mxu0 }
 0x3d7   :  { %v729_v7 = vadd.f32 %v3750_v5, %v728_v6  ;;  %v4234_v8 = vpop.f32.mrb[3].mxu0 }
 0x3d9   :  { %v3758_v9 = vmul.f32 -1.442695, %v729_v7 }
 0x3da   :  { %v733_v10 = vpop.f32.mrb[8].mxu0 }
 0x3db   :  { %4881 = vpow2.f32 %v3758_v9  ;;  %v734_v11 = vadd.f32 %v3750_v5, %v733_v10  ;;  %v4237_v12 = vpop.f32.mrb[9].mxu0 }
 0x3dd   :  { %v3759_v13 = vmul.f32 -1.442695, %v734_v11 }
 0x3de   :  { %v738_v14 = vpop.f32.mrb[10].mxu0 }
 0x3df   :  { %4883 = vpow2.f32 %v3759_v13  ;;  %v739_v15 = vadd.f32 %v3750_v5, %v738_v14  ;;  %v4240_v16 = vpop.f32.mrb[11].mxu0  ;;  %v862_v13 = vld [vmem:[%s6143_s14] sm:$0xff]  ;;  %v863_v14 = vld [vmem:[%s6143_s14 + $0x8] sm:$0xff] }
 0x3e0   :  { %v5546_v16 = vld [vmem:[%s6159_s2] sm:$0xf] }
 0x3e1   :  { %v3760_v17 = vmul.f32 -1.442695, %v739_v15 }
 0x3e2   :  { %v743_v19 = vpop.f32.mrb[12].mxu0 }
 0x3e3   :  { %4885 = vpow2.f32 %v3760_v17  ;;  %v744_v22 = vadd.f32 %v3750_v5, %v743_v19  ;;  %v4243_v23 = vpop.f32.mrb[13].mxu0  ;;  %v4682_v17 = vpack.c.bf16 %v863_v14, %v862_v13  ;;  %v864_v19 = vld [vmem:[%s6143_s14 + $0x10] sm:$0xff] }
 0x3e5   :  { %v4882_v24 = vpop.eup %4881  ;;  %v3761_v25 = vmul.f32 -1.442695, %v744_v22 }
 0x3e6   :  { %v783_v26 = vadd.f32 1.0, %v4882_v24  ;;  %v748_v27 = vpop.f32.mrb[14].mxu0 }
 0x3e7   :  { %4887 = vpow2.f32 %v3761_v25  ;;  %v749_v28 = vadd.f32 %v3750_v5, %v748_v27  ;;  %v4246_v32 = vpop.f32.mrb[15].mxu0 }
 0x3e8   :  { %4889 = vrcp.f32 %v783_v26 }
 0x3e9   :  { %v4884_v36 = vpop.eup %4883  ;;  %v3762_v37 = vmul.f32 -1.442695, %v749_v28 }
 0x3ea   :  { %v784_v38 = vadd.f32 1.0, %v4884_v36  ;;  %v753_v39 = vpop.f32.mrb[16].mxu0  ;;  %v1028_v36 = vld [vmem:[#allocation7] sm:$0xff] }
 0x3eb   :  { %4891 = vpow2.f32 %v3762_v37  ;;  %v754_v40 = vadd.f32 %v3750_v5, %v753_v39  ;;  %v4249_v41 = vpop.f32.mrb[17].mxu0  ;;  %v1029_v37 = vld [vmem:[#allocation7 + $0x8] sm:$0xff]  ;;  %v1030_v39 = vld [vmem:[#allocation7 + $0x10] sm:$0xff] }
 0x3ec   :  { %4893 = vrcp.f32 %v784_v38  ;;  %v4688_v38 = vpack.c.bf16 %v1029_v37, %v1028_v36 }
 0x3ed   :  { %v4886_v42 = vpop.eup %4885  ;;  %v3763_v43 = vmul.f32 -1.442695, %v754_v40 }
 0x3ee   :  { %v785_v44 = vadd.f32 1.0, %v4886_v42  ;;  %v758_v45 = vpop.f32.mrb[18].mxu0  ;;  %v3772_v42 = vld [vmem:[%s6139_s10 + $0x20] sm:$0xff] }
 0x3ef   :  { %4895 = vpow2.f32 %v3763_v43  ;;  %v759_v46 = vadd.f32 %v3750_v5, %v758_v45  ;;  %v4252_v47 = vpop.f32.mrb[19].mxu0  ;;  %v3773_v43 = vld [vmem:[%s6139_s10 + $0x28] sm:$0xff] }
 0x3f0   :  { %4897 = vrcp.f32 %v785_v44  ;;  %v4694_v44 = vpack.c.bf16 %v3773_v43, %v3772_v42 }
 0x3f1   :  { %v4888_v48 = vpop.eup %4887  ;;  %v3764_v49 = vmul.f32 -1.442695, %v759_v46 }
 0x3f2   :  { %v786_v50 = vadd.f32 1.0, %v4888_v48  ;;  %v4890_v51 = vpop.eup %4889 }
 0x3f3   :  { %4899 = vpow2.f32 %v3764_v49  ;;  %v804_v55 = vmul.f32 %v4890_v51, %v729_v7 }
 0x3f4   :  { %4901 = vrcp.f32 %v786_v50 }
 0x3f5   :  { %v4892_v52 = vpop.eup %4891 }
 0x3f6   :  { %v4894_v53 = vpop.eup %4893  ;;  %v787_v54 = vadd.f32 1.0, %v4892_v52 }
 0x3f7   :  { %v805_v56 = vmul.f32 %v4894_v53, %v734_v11  ;;  %v3777_v53 = vld [vmem:[%s6140_s11 + $0x20] sm:$0xff] }
 0x3f8   :  { %4903 = vrcp.f32 %v787_v54  ;;  %v3778_v54 = vld [vmem:[%s6140_s11 + $0x28] sm:$0xff] }
 0x3f9   :  { %v4896_v58 = vpop.eup %4895  ;;  %v811_v57 = vpack.c.bf16 %v805_v56, %v804_v55  ;;  %v4700_v56 = vpack.c.bf16 %v3778_v54, %v3777_v53 }
 0x3fa   :  { %v788_v59 = vadd.f32 1.0, %v4896_v58  ;;  %v4898_v60 = vpop.eup %4897 }
 0x3fb   :  { %4254 = vmatpush3.bf16.msra.mxu1 %v811_v57  ;;  %v806_v2 = vmul.f32 %v4898_v60, %v739_v15  ;;  %v3774_v57 = vld [vmem:[%s6139_s10 + $0x30] sm:$0xff] }
 0x3fc   :  { %4905 = vrcp.f32 %v788_v59  ;;  %4255 = vmatprep.subr.bf16.mxu1 %v5204_v0  ;;  %v3775_v59 = vld [vmem:[%s6139_s10 + $0x38] sm:$0xff]  ;;  %v3779_v60 = vld [vmem:[%s6140_s11 + $0x30] sm:$0xff] }
 0x3fd   :  { %v4900_v61 = vpop.eup %4899 }
 0x3fe   :  { %v4902_v62 = vpop.eup %4901  ;;  %v789_v63 = vadd.f32 1.0, %v4900_v61  ;;  %v4697_v61 = vpack.c.bf16 %v3775_v59, %v3774_v57 }
 0x3ff   :  { %v807_v3 = vmul.f32 %v4902_v62, %v744_v22  ;;  %v865_v22 = vld [vmem:[%s6143_s14 + $0x18] sm:$0xff] }
 0x400   :  { %4907 = vrcp.f32 %v789_v63  ;;  %v4685_v23 = vpack.c.bf16 %v865_v22, %v864_v19  ;;  %v3780_v62 = vld [vmem:[%s6140_s11 + $0x38] sm:$0xff] }
 0x401   :  { %v812_v4 = vpack.c.bf16 %v807_v3, %v806_v2  ;;  %v4703_v63 = vpack.c.bf16 %v3780_v62, %v3779_v60  ;;  %v3770_v2 = vld [vmem:[%s6147_s18] ss:$0 sm:$0xff]  ;;  %v3790_v19 = vld [vmem:[%s6133_s4 + $0x38] sm:$0xff] }
 0x402   :  { %v4904_v5 = vpop.eup %4903 }
 0x403   :  { %4256 = vmatpush3.bf16.msra.mxu1 %v812_v4  ;;  %v808_v7 = vmul.f32 %v4904_v5, %v749_v28 }
 0x404   :  { %4257 = vmatprep.subr.bf16.mxu1 %v5204_v0 }
 0x406   :  { %v4906_v6 = vpop.eup %4905 }
 0x407   :  { %v809_v8 = vmul.f32 %v4906_v6, %v754_v40  ;;  %v1031_v40 = vld [vmem:[#allocation7 + $0x18] sm:$0xff] }
 0x408   :  { %v4691_v41 = vpack.c.bf16 %v1031_v40, %v1030_v39 }
 0x409   :  { %v813_v9 = vpack.c.bf16 %v809_v8, %v808_v7 }
 0x40a   :  { %v4908_v10 = vpop.eup %4907 }
 0x40b   :  { %v810_v11 = vmul.f32 %v4908_v10, %v759_v46  ;;  %4258 = vmatpush3.bf16.msra.mxu1 %v813_v9  ;;  %v3768_v46 = vld [vmem:[%s6145_s16] ss:$0 sm:$0xff] }
 0x40c   :  { %4259 = vmatprep.subr.bf16.mxu1 %v5204_v0 }
 0x40d   :  { %v814_v12 = vpack.c.bf16 %v810_v11, %v810_v11 }
 0x40f   :  { %v820_v15 = vsel %vm144_vm1, %v814_v12, 0 }
 0x410   :  { %4260 = vmatpush3.bf16.msra.mxu1 %v820_v15 }
 0x411   :  { %4681 = vmatprep.subr.bf16.mxu1 %v5206_v1 }
 0x413   :  { %4262 = vmatmul.mubr.msk.bf16.vlgmr.msra.gmra.mrb[16].mxu1 %vm815_vm5, %v5546_v16 }
 0x414   :  { %4683 = vmatpush3.bf16.msra.mxu1 %v4682_v17  ;;  %4284 = vmatprep.mubr.msk.f32.mxu1 %vm5205_vm0, %v5204_v0  ;;  %v3792_v17 = vld [vmem:[%s6133_s4 + $0x48] sm:$0xff] }
 0x415   :  { %4684 = vmatprep.subr.bf16.mxu1 %v5206_v1 }
 0x418   :  { %4686 = vmatpush3.bf16.msra.mxu1 %v4685_v23 }
 0x419   :  { %4693 = vmatprep.subr.bf16.mxu1 %v5206_v1 }
 0x41b   :  { %4285 = vmatmul.mubr.msk.f32.vlgmr.msra.gmra.mrb[20].mxu1 %vm222_vm3, %v5398_v18 }
 0x41c   :  { %4306 = vmatprep.mubr.msk.f32.mxu1 %vm5205_vm0, %v5204_v0  ;;  %4695 = vmatpush3.bf16.msra.mxu1 %v4694_v44 }
 0x41d   :  { %4696 = vmatprep.subr.bf16.mxu1 %v5206_v1 }
 0x420   :  { %4698 = vmatpush3.bf16.msra.mxu1 %v4697_v61 }
 0x4e6   :  { %v856_v24 = vpop.f32.mrb[16].mxu1 }
 0x4e7   :  { %v4263_v25 = vpop.f32.mrb[17].mxu1  ;;  %4274 = vmatmul.mubr.msk.f32.vlgmr.msra.gmra.mrb[20].mxu0 %vm222_vm3, %v856_v24 }
 0x4e8   :  { %v859_v26 = vpop.f32.mrb[18].mxu1  ;;  %4295 = vmatprep.mubr.msk.f32.mxu0 %vm5205_vm0, %v5204_v0  ;;  %4689 = vmatpush3.bf16.msra.mxu0 %v4688_v38  ;;  %v3793_v25 = vld [vmem:[%s6133_s4 + $0x50] sm:$0xff] }
 0x4e9   :  { %v4264_v27 = vpop.f32.mrb[19].mxu1  ;;  %4690 = vmatprep.subr.bf16.mxu0 %v5206_v1  ;;  %v3791_v26 = vld [vmem:[%s6133_s4 + $0x40] sm:$0xff] }
 0x4ec   :  { %4692 = vmatpush3.bf16.msra.mxu0 %v4691_v41 }
 0x4ed   :  { %4699 = vmatprep.subr.bf16.mxu0 %v5206_v1 }
 0x4ee   :  { %v1009_v28 = vpop.f32.mrb[20].mxu1 }
 0x4ef   :  { %v4286_v32 = vpop.f32.mrb[21].mxu1 }
 0x5ba   :  { %v939_v45 = vpop.f32.mrb[20].mxu0 }
 0x5bb   :  { %v1010_v47 = vadd.f32 %v1009_v28, %v939_v45  ;;  %v4275_v48 = vpop.f32.mrb[21].mxu0  ;;  %v3794_v45 = vld [vmem:[%s6133_s4 + $0x58] sm:$0xff] }
 0x5bd   :  { %v1020_v49 = vadd.f32 %v3768_v46, %v1010_v47 }
 0x5bf   :  { %v3769_v50 = vmul.f32 -1.442695, %v1020_v49 }
 0x5c1   :  { %4909 = vpow2.f32 %v3769_v50 }
 0x5cb   :  { %v4910_v51 = vpop.eup %4909 }
 0x5cc   :  { %v1024_v52 = vadd.f32 1.0, %v4910_v51 }
 0x5ce   :  { %4911 = vrcp.f32 %v1024_v52  ;;  %v3796_v52 = vld [vmem:[%s6133_s4 + $0x68] sm:$0xff] }
 0x5d8   :  { %v4912_v55 = vpop.eup %4911 }
 0x5d9   :  { %v1027_v58 = vmul.f32 %v4912_v55, %v1020_v49  ;;  %v3795_v49 = vld [vmem:[%s6133_s4 + $0x60] sm:$0xff] }
 0x5db   :  { %4296 = vmatmul.mubr.msk.f32.vlgmr.msra.gmra.mrb[22].mxu0 %vm222_vm3, %v1027_v58 }
 0x5dc   :  { %4701 = vmatpush3.bf16.msra.mxu0 %v4700_v56  ;;  %4317 = vmatprep.mubr.msk.f32.mxu0 %vm5205_vm0, %v5204_v0 }
 0x5dd   :  { %4702 = vmatprep.subr.bf16.mxu0 %v5206_v1 }
 0x5e0   :  { %4704 = vmatpush3.bf16.msra.mxu0 %v4703_v63 }
 0x5e1   :  { %4705 = vmatprep.subr.bf16.mxu0 %v5206_v1 }
 0x6ae   :  { %v1108_v3 = vpop.f32.mrb[22].mxu0 }
 0x6af   :  { %v1109_v4 = vadd.f32 %v3770_v2, %v1108_v3  ;;  %v4297_v5 = vpop.f32.mrb[23].mxu0 }
 0x6b1   :  { %v5607_v6 = vadd.f32 %v1109_v4, %v5398_v18 }
 0x6b3   :  { %4307 = vmatmul.mubr.msk.f32.vlgmr.msra.gmra.mrb[22].mxu1 %vm222_vm3, %v5607_v6  ;;  %4318 = vmatmul.mubr.msk.f32.vlgmr.msra.gmra.mrb[24].mxu0 %vm222_vm3, %v5607_v6 }
 0x6b4   :  { %4322 = vmatprep.mubr.msk.bf16.mxu1 %vm390_vm4, %v5414_v21  ;;  %4348 = vmatprep.mubr.msk.f32.mxu0 %vm5205_vm0, %v5204_v0  ;;  %v3805_v21 = vld [vmem:[%s6141_s12 + $0x28] sm:$0xff] }
 0x786   :  { %v1187_v7 = vpop.f32.mrb[22].mxu1  ;;  %v1262_v8 = vpop.f32.mrb[24].mxu0 }
 0x787   :  { %v1267_v9 = vpack.c.bf16 %v1262_v8, %v1262_v8  ;;  %v4308_v10 = vpop.f32.mrb[23].mxu1  ;;  %v4319_v11 = vpop.f32.mrb[25].mxu0  ;;  %v1266_v12 = vpack.c.bf16 %v1187_v7, %v1187_v7 }
 0x789   :  { %v1269_v18 = vsel %vm144_vm1, %v1267_v9, 0  ;;  %4828 = vmatprep.subr.msk.bf16.mxu1 %vm144_vm1, %v1267_v9  ;;  %v1336_v13 = vsel %vm144_vm1, %v1266_v12, 0 }
 0x78a   :  { %4321 = vmatpush3.bf16.msra.mxu1 %v1269_v18 }
 0x78b   :  { %4829 = vmatprep.subr.msk.bf16.mxu1 %vm144_vm1, %v1266_v12 }
 0x78d   :  { %4323 = vmatmul.mubr.msk.bf16.vlgmr.msra.gmra.mrb[24].mxu1 %vm390_vm4, %v5429_v30  ;;  %v3806_v30 = vld [vmem:[%s6141_s12 + $0x30] sm:$0xff] }
 0x78e   :  { %4331 = vmatpush3.bf16.msra.mxu1 %v1336_v13  ;;  %4326 = vmatprep.mubr.msk.bf16.mxu1 %vm390_vm4, %v5407_v20  ;;  %v3804_v20 = vld [vmem:[%s6141_s12 + $0x20] sm:$0xff] }
 0x78f   :  { %4369 = vmatprep.subr.bf16.mxu1 %v5204_v0 }
 0x795   :  { %4327 = vmatmul.mubr.msk.bf16.gmra.mrb[28].mxu1 %vm390_vm4, %v5424_v29  ;;  %v4706_v29 = vpack.c.bf16 %v3805_v21, %v3804_v20 }
 0x796   :  { %4332 = vmatprep.mubr.msk.bf16.mxu1 %vm390_vm4, %v5434_v31  ;;  %v3807_v31 = vld [vmem:[%s6141_s12 + $0x38] sm:$0xff] }
 0x797   :  { %4707 = vmatpush3.bf16.msra.mxu0 %v4706_v29 }
 0x798   :  { %4708 = vmatprep.subr.bf16.mxu0 %v5206_v1 }
 0x79d   :  { %4333 = vmatmul.mubr.msk.bf16.vlgmr.msra.gmra.mrb[24].mxu1 %vm390_vm4, %v5451_v33  ;;  %v4709_v33 = vpack.c.bf16 %v3807_v31, %v3806_v30 }
 0x79e   :  { %4336 = vmatprep.mubr.msk.bf16.mxu1 %vm390_vm4, %v5456_v34 }
 0x79f   :  { %4710 = vmatpush3.bf16.msra.mxu0 %v4709_v33 }
 0x7a0   :  { %4711 = vmatprep.subr.bf16.mxu0 %v5206_v1 }
 0x7a5   :  { %4337 = vmatmul.mubr.msk.bf16.gmra.mrb[32].mxu1 %vm390_vm4, %v5465_v35 }
 0x7a6   :  { %4377 = vmatprep.mubr.msk.bf16.mxu1 %vm5205_vm0, %v5204_v0 }
 0x868   :  { %v4328_v34 = vpop.f32.mrb[28].mxu1 }
 0x869   :  { %v1321_v35 = vpop.f32.mrb[29].mxu1 }
 0x86a   :  { %v4329_v14 = vpop.f32.mrb[30].mxu1 }
 0x86b   :  { %v1324_v15 = vpop.f32.mrb[31].mxu1 }
 0x870   :  { %v4334_v22 = vpop.f32.mrb[24].mxu1 }
 0x871   :  { %v5658_v23 = vadd.f32 %v4334_v22, %v3792_v17  ;;  %v1372_v24 = vpop.f32.mrb[25].mxu1  ;;  %v1702_v17 = vld [vmem:[#allocation6 + $0x20] sm:$0xff]  ;;  %v1704_v22 = vld [vmem:[#allocation6 + $0x30] sm:$0xff] }
 0x872   :  { %v1410_v27 = vadd.f32 %v3790_v19, %v1372_v24  ;;  %v4335_v28 = vpop.f32.mrb[26].mxu1  ;;  %v1703_v19 = vld [vmem:[#allocation6 + $0x28] sm:$0xff]  ;;  %v1705_v24 = vld [vmem:[#allocation6 + $0x38] sm:$0xff] }
 0x873   :  { %v3799_v32 = vmul.f32 -1.442695, %v5658_v23  ;;  %v1375_v36 = vpop.f32.mrb[27].mxu1  ;;  %v1413_v38 = vadd.f32 %v4335_v28, %v3793_v25  ;;  %v4715_v25 = vpack.c.bf16 %v1705_v24, %v1704_v22 }
 0x874   :  { %v3797_v37 = vmul.f32 -1.442695, %v1410_v27  ;;  %v1411_v39 = vadd.f32 %v3791_v26, %v1375_v36  ;;  %v3808_v26 = vld [vmem:[#allocation4 + $0x1] ss:$0 sm:$0xff] }
 0x875   :  { %v3800_v41 = vmul.f32 -1.442695, %v1413_v38 }
 0x876   :  { %4913 = vpow2.f32 %v3797_v37  ;;  %v3798_v40 = vmul.f32 -1.442695, %v1411_v39 }
 0x877   :  { %4915 = vpow2.f32 %v3799_v32 }
 0x878   :  { %4917 = vpow2.f32 %v3798_v40  ;;  %v4338_v42 = vpop.f32.mrb[32].mxu1 }
 0x879   :  { %v1397_v43 = vadd.f32 %v4338_v42, %v4328_v34  ;;  %v1388_v44 = vpop.f32.mrb[33].mxu1  ;;  %4919 = vpow2.f32 %v3800_v41 }
 0x87a   :  { %v1389_v46 = vadd.f32 %v1388_v44, %v1321_v35  ;;  %v4339_v47 = vpop.f32.mrb[34].mxu1 }
 0x87b   :  { %v1391_v48 = vpop.f32.mrb[35].mxu1  ;;  %v1416_v56 = vadd.f32 %v3796_v52, %v1397_v43 }
 0x87c   :  { %v1414_v50 = vadd.f32 %v3794_v45, %v1389_v46  ;;  %v1392_v51 = vadd.f32 %v1391_v48, %v1324_v15 }
 0x87d   :  { %v3803_v62 = vmul.f32 -1.442695, %v1416_v56 }
 0x87e   :  { %v3801_v53 = vmul.f32 -1.442695, %v1414_v50  ;;  %v1415_v54 = vadd.f32 %v3795_v49, %v1392_v51 }
 0x880   :  { %v4914_v55 = vpop.eup %4913  ;;  %4921 = vpow2.f32 %v3801_v53  ;;  %v3802_v60 = vmul.f32 -1.442695, %v1415_v54 }
 0x881   :  { %v4916_v58 = vpop.eup %4915  ;;  %v1438_v57 = vadd.f32 1.0, %v4914_v55 }
 0x882   :  { %v4918_v59 = vpop.eup %4917  ;;  %v1440_v63 = vadd.f32 1.0, %v4916_v58 }
 0x883   :  { %4923 = vrcp.f32 %v1438_v57  ;;  %v1439_v61 = vadd.f32 1.0, %v4918_v59  ;;  %v4920_v2 = vpop.eup %4919 }
 0x884   :  { %v1441_v3 = vadd.f32 1.0, %v4920_v2 }
 0x885   :  { %4925 = vrcp.f32 %v1439_v61 }
 0x886   :  { %4927 = vpow2.f32 %v3802_v60 }
 0x887   :  { %4929 = vpow2.f32 %v3803_v62 }
 0x888   :  { %4931 = vrcp.f32 %v1440_v63 }
 0x889   :  { %4933 = vrcp.f32 %v1441_v3 }
 0x88a   :  { %v4922_v4 = vpop.eup %4921 }
 0x88b   :  { %v1442_v7 = vadd.f32 1.0, %v4922_v4 }
 0x88d   :  { %v4924_v5 = vpop.eup %4923  ;;  %4935 = vrcp.f32 %v1442_v7 }
 0x88e   :  { %v1459_v8 = vmul.f32 %v4924_v5, %v1410_v27 }
 0x88f   :  { %v4926_v9 = vpop.eup %4925 }
 0x890   :  { %v4928_v10 = vpop.eup %4927  ;;  %4349 = vmatmul.mubr.msk.f32.vlgmr.msra.gmra.mrb[26].mxu0 %vm222_vm3, %v1459_v8  ;;  %v1460_v18 = vmul.f32 %v4926_v9, %v1411_v39 }
 0x891   :  { %v1443_v11 = vadd.f32 1.0, %v4928_v10  ;;  %4351 = vmatprep.mubr.msk.f32.mxu0 %vm5205_vm0, %v5204_v0  ;;  %v4930_v12 = vpop.eup %4929 }
 0x892   :  { %v4932_v13 = vpop.eup %4931  ;;  %v1444_v20 = vadd.f32 1.0, %v4930_v12 }
 0x893   :  { %4937 = vrcp.f32 %v1443_v11  ;;  %v1461_v21 = vmul.f32 %v4932_v13, %v5658_v23  ;;  %v4934_v29 = vpop.eup %4933  ;;  %v4712_v23 = vpack.c.bf16 %v1703_v19, %v1702_v17 }
 0x894   :  { %4352 = vmatmul.mubr.msk.f32.gmra.mrb[28].mxu0 %vm222_vm3, %v1460_v18  ;;  %4939 = vrcp.f32 %v1444_v20  ;;  %v1462_v30 = vmul.f32 %v4934_v29, %v1413_v38 }
 0x895   :  { %4354 = vmatprep.mubr.msk.f32.mxu0 %vm5205_vm0, %v5204_v0  ;;  %4713 = vmatpush3.bf16.msra.mxu0 %v4712_v23 }
 0x896   :  { %4714 = vmatprep.subr.bf16.mxu0 %v5206_v1 }
 0x897   :  { %v4936_v31 = vpop.eup %4935 }
 0x898   :  { %4355 = vmatmul.mubr.msk.f32.gmra.mrb[30].mxu0 %vm222_vm3, %v1461_v21  ;;  %v1463_v33 = vmul.f32 %v4936_v31, %v1414_v50 }
 0x899   :  { %4357 = vmatprep.mubr.msk.f32.mxu0 %vm5205_vm0, %v5204_v0  ;;  %4716 = vmatpush3.bf16.msra.mxu0 %v4715_v25 }
 0x89a   :  { %4723 = vmatprep.subr.bf16.mxu0 %v5206_v1 }
 0x89c   :  { %4358 = vmatmul.mubr.msk.f32.gmra.mrb[32].mxu0 %vm222_vm3, %v1462_v30 }
 0x89d   :  { %4360 = vmatprep.mubr.msk.f32.mxu0 %vm5205_vm0, %v5204_v0  ;;  %v4938_v34 = vpop.eup %4937 }
 0x89e   :  { %v1464_v35 = vmul.f32 %v4938_v34, %v1415_v54  ;;  %v4940_v14 = vpop.eup %4939 }
 0x89f   :  { %v1465_v15 = vmul.f32 %v4940_v14, %v1416_v56 }
 0x8a0   :  { %4361 = vmatmul.mubr.msk.f32.gmra.mrb[34].mxu0 %vm222_vm3, %v1463_v33 }
 0x8a1   :  { %4363 = vmatprep.mubr.msk.f32.mxu0 %vm5205_vm0, %v5204_v0 }
 0x8a4   :  { %4364 = vmatmul.mubr.msk.f32.gmra.mrb[36].mxu0 %vm222_vm3, %v1464_v35 }
 0x8a5   :  { %4366 = vmatprep.mubr.msk.f32.mxu0 %vm5205_vm0, %v5204_v0 }
 0x8a8   :  { %4367 = vmatmul.mubr.msk.f32.gmra.mrb[38].mxu0 %vm222_vm3, %v1465_v15 }
 0x8a9   :  { %4389 = vmatprep.mubr.msk.f32.mxu0 %vm5205_vm0, %v5204_v0 }
 0x963   :  { %v1566_v27 = vpop.f32.mrb[26].mxu0 }
 0x964   :  { %v1567_v28 = vadd.f32 %v3808_v26, %v1566_v27  ;;  %v4350_v32 = vpop.f32.mrb[27].mxu0  ;;  %v3824_v27 = vld [vmem:[%s6143_s14 + $0x20] sm:$0xff] }
 0x966   :  { %v3816_v36 = vmul.f32 -1.442695, %v1567_v28 }
 0x967   :  { %v1571_v37 = vpop.f32.mrb[28].mxu0 }
 0x968   :  { %4941 = vpow2.f32 %v3816_v36  ;;  %v1572_v38 = vadd.f32 %v3808_v26, %v1571_v37  ;;  %v4353_v39 = vpop.f32.mrb[29].mxu0  ;;  %v3826_v37 = vld [vmem:[%s6143_s14 + $0x30] sm:$0xff] }
 0x96a   :  { %v3817_v40 = vmul.f32 -1.442695, %v1572_v38 }
 0x96b   :  { %v1576_v41 = vpop.f32.mrb[30].mxu0 }
 0x96c   :  { %4943 = vpow2.f32 %v3817_v40  ;;  %v1577_v42 = vadd.f32 %v3808_v26, %v1576_v41  ;;  %v4356_v43 = vpop.f32.mrb[31].mxu0 }
 0x96e   :  { %v3818_v44 = vmul.f32 -1.442695, %v1577_v42 }
 0x96f   :  { %v1581_v45 = vpop.f32.mrb[32].mxu0 }
 0x970   :  { %4945 = vpow2.f32 %v3818_v44  ;;  %v1582_v46 = vadd.f32 %v3808_v26, %v1581_v45  ;;  %v4359_v47 = vpop.f32.mrb[33].mxu0  ;;  %v1866_v45 = vld [vmem:[#allocation7 + $0x20] sm:$0xff] }
 0x972   :  { %v4942_v48 = vpop.eup %4941  ;;  %v3819_v49 = vmul.f32 -1.442695, %v1582_v46 }
 0x973   :  { %v1621_v50 = vadd.f32 1.0, %v4942_v48  ;;  %v1586_v51 = vpop.f32.mrb[34].mxu0  ;;  %v1868_v48 = vld [vmem:[#allocation7 + $0x30] sm:$0xff] }
 0x974   :  { %4947 = vpow2.f32 %v3819_v49  ;;  %v1587_v52 = vadd.f32 %v3808_v26, %v1586_v51  ;;  %v4362_v53 = vpop.f32.mrb[35].mxu0  ;;  %v1869_v49 = vld [vmem:[#allocation7 + $0x38] sm:$0xff]  ;;  %v3836_v51 = vld [vmem:[%s6139_s10 + $0x40] sm:$0xff] }
 0x975   :  { %4949 = vrcp.f32 %v1621_v50  ;;  %v4727_v50 = vpack.c.bf16 %v1869_v49, %v1868_v48  ;;  %v3855_v48 = vld [vmem:[%s6133_s4 + $0x78] sm:$0xff] }
 0x976   :  { %v4944_v54 = vpop.eup %4943  ;;  %v3820_v55 = vmul.f32 -1.442695, %v1587_v52 }
 0x977   :  { %v1622_v56 = vadd.f32 1.0, %v4944_v54  ;;  %v1591_v58 = vpop.f32.mrb[36].mxu0 }
 0x978   :  { %4951 = vpow2.f32 %v3820_v55  ;;  %v1592_v57 = vadd.f32 %v3808_v26, %v1591_v58  ;;  %v4365_v59 = vpop.f32.mrb[37].mxu0  ;;  %v3831_v55 = vld [vmem:[%s6145_s16 + $0x1] ss:$0 sm:$0xff] }
 0x979   :  { %4953 = vrcp.f32 %v1622_v56 }
 0x97a   :  { %v4946_v60 = vpop.eup %4945  ;;  %v3821_v61 = vmul.f32 -1.442695, %v1592_v57 }
 0x97b   :  { %v1623_v62 = vadd.f32 1.0, %v4946_v60  ;;  %v1596_v63 = vpop.f32.mrb[38].mxu0 }
 0x97c   :  { %4955 = vpow2.f32 %v3821_v61  ;;  %v1597_v2 = vadd.f32 %v3808_v26, %v1596_v63  ;;  %v4368_v3 = vpop.f32.mrb[39].mxu0  ;;  %v3842_v63 = vld [vmem:[%s6140_s11 + $0x48] sm:$0xff] }
 0x97d   :  { %4957 = vrcp.f32 %v1623_v62  ;;  %v3841_v62 = vld [vmem:[%s6140_s11 + $0x40] sm:$0xff] }
 0x97e   :  { %v4948_v4 = vpop.eup %4947  ;;  %v3822_v5 = vmul.f32 -1.442695, %v1597_v2  ;;  %v4736_v3 = vpack.c.bf16 %v3842_v63, %v3841_v62 }
 0x97f   :  { %v1624_v7 = vadd.f32 1.0, %v4948_v4  ;;  %v4950_v8 = vpop.eup %4949 }
 0x980   :  { %4959 = vpow2.f32 %v3822_v5  ;;  %v1642_v12 = vmul.f32 %v4950_v8, %v1567_v28  ;;  %v3825_v28 = vld [vmem:[%s6143_s14 + $0x28] sm:$0xff]  ;;  %v3838_v5 = vld [vmem:[%s6139_s10 + $0x50] sm:$0xff] }
 0x981   :  { %4961 = vrcp.f32 %v1624_v7  ;;  %v4718_v36 = vpack.c.bf16 %v3825_v28, %v3824_v27  ;;  %v3839_v7 = vld [vmem:[%s6139_s10 + $0x58] sm:$0xff]  ;;  %v3843_v8 = vld [vmem:[%s6140_s11 + $0x50] sm:$0xff]  ;;  %v3868_v27 = vld [vmem:[%s6141_s12 + $0x40] sm:$0xff] }
 0x982   :  { %v4952_v9 = vpop.eup %4951  ;;  %v3869_v28 = vld [vmem:[%s6141_s12 + $0x48] sm:$0xff] }
 0x983   :  { %v4954_v10 = vpop.eup %4953  ;;  %v1625_v11 = vadd.f32 1.0, %v4952_v9  ;;  %v4733_v9 = vpack.c.bf16 %v3839_v7, %v3838_v5  ;;  %v3860_v7 = vld [vmem:[%s6133_s4 + $0xa0] sm:$0xff] }
 0x984   :  { %v1643_v18 = vmul.f32 %v4954_v10, %v1572_v38  ;;  %v3827_v38 = vld [vmem:[%s6143_s14 + $0x38] sm:$0xff] }
 0x985   :  { %4963 = vrcp.f32 %v1625_v11  ;;  %v4721_v39 = vpack.c.bf16 %v3827_v38, %v3826_v37  ;;  %v3844_v10 = vld [vmem:[%s6140_s11 + $0x58] sm:$0xff] }
 0x986   :  { %v4956_v13 = vpop.eup %4955  ;;  %v1649_v20 = vpack.c.bf16 %v1643_v18, %v1642_v12  ;;  %v4739_v11 = vpack.c.bf16 %v3844_v10, %v3843_v8  ;;  %v3834_v12 = vld [vmem:[%s6147_s18 + $0x1] ss:$0 sm:$0xff]  ;;  %v3871_v37 = vld [vmem:[%s6141_s12 + $0x58] sm:$0xff] }
 0x987   :  { %v1626_v21 = vadd.f32 1.0, %v4956_v13  ;;  %v4958_v29 = vpop.eup %4957 }
 0x988   :  { %4370 = vmatpush3.bf16.msra.mxu1 %v1649_v20  ;;  %v1644_v34 = vmul.f32 %v4958_v29, %v1577_v42  ;;  %v5778_v29 = vld [vmem:[%s6157_s1] sm:$0xff]  }
 0x989   :  { %4965 = vrcp.f32 %v1626_v21  ;;  %4371 = vmatprep.subr.bf16.mxu1 %v5204_v0 }
 0x98a   :  { %v4960_v30 = vpop.eup %4959 }
 0x98b   :  { %v4962_v31 = vpop.eup %4961  ;;  %v1627_v33 = vadd.f32 1.0, %v4960_v30 }
 0x98c   :  { %v1645_v35 = vmul.f32 %v4962_v31, %v1582_v46  ;;  %v1867_v46 = vld [vmem:[#allocation7 + $0x28] sm:$0xff] }
 0x98d   :  { %4967 = vrcp.f32 %v1627_v33  ;;  %v4724_v47 = vpack.c.bf16 %v1867_v46, %v1866_v45 }
 0x98e   :  { %v1650_v14 = vpack.c.bf16 %v1645_v35, %v1644_v34 }
 0x98f   :  { %v4964_v15 = vpop.eup %4963 }
 0x990   :  { %4372 = vmatpush3.bf16.msra.mxu1 %v1650_v14  ;;  %v1646_v19 = vmul.f32 %v4964_v15, %v1587_v52  ;;  %v3837_v52 = vld [vmem:[%s6139_s10 + $0x48] sm:$0xff] }
 0x991   :  { %4373 = vmatprep.subr.bf16.mxu1 %v5204_v0  ;;  %v4730_v53 = vpack.c.bf16 %v3837_v52, %v3836_v51 }
 0x993   :  { %v4966_v17 = vpop.eup %4965 }
 0x994   :  { %v1647_v22 = vmul.f32 %v4966_v17, %v1592_v57  ;;  %v5791_v17 = vld [vmem:[%s6157_s1 + $0x8] sm:$0xff]  }
 0x996   :  { %v1651_v23 = vpack.c.bf16 %v1647_v22, %v1646_v19  ;;  %v5798_v19 = vld [vmem:[%s6157_s1 + $0x10] sm:$0xff]   ;;  %v5806_v22 = vld [vmem:[%s6157_s1 + $0x18] ss:$0 sps:$4 sm:$0xff]  }
 0x997   :  { %v4968_v24 = vpop.eup %4967 }
 0x998   :  { %v1648_v25 = vmul.f32 %v4968_v24, %v1597_v2  ;;  %4374 = vmatpush3.bf16.msra.mxu1 %v1651_v23  ;;  %v5813_v23 = vld [vmem:[%s6158_s0] sm:$0xff]   ;;  %v5820_v24 = vld [vmem:[%s6158_s0 + $0x8] sm:$0xff]  }
 0x999   :  { %4375 = vmatprep.subr.bf16.mxu1 %v5204_v0 }
 0x99a   :  { %v1652_v26 = vpack.c.bf16 %v1648_v25, %v1648_v25  ;;  %v5827_v25 = vld [vmem:[%s6158_s0 + $0x10] sm:$0xff]  }
 0x99c   :  { %v1654_v32 = vsel %vm144_vm1, %v1652_v26, 0  ;;  %v5834_v26 = vld [vmem:[%s6158_s0 + $0x18] ss:$0 sps:$4 sm:$0xff]  }
 0x99d   :  { %4376 = vmatpush3.bf16.msra.mxu1 %v1654_v32  ;;  %v4742_v32 = vpack.c.bf16 %v3869_v28, %v3868_v27 }
 0x99e   :  { %4717 = vmatprep.subr.bf16.mxu1 %v5206_v1 }
 0x9a0   :  { %4378 = vmatmul.mubr.msk.bf16.vlgmr.msra.gmra.mrb[36].mxu1 %vm815_vm5, %v5546_v16 }
 0x9a1   :  { %4719 = vmatpush3.bf16.msra.mxu1 %v4718_v36  ;;  %4400 = vmatprep.mubr.msk.f32.mxu1 %vm5205_vm0, %v5204_v0  ;;  %v3870_v36 = vld [vmem:[%s6141_s12 + $0x50] sm:$0xff] }
 0x9a2   :  { %4720 = vmatprep.subr.bf16.mxu1 %v5206_v1  ;;  %v4745_v38 = vpack.c.bf16 %v3871_v37, %v3870_v36 }
 0x9a5   :  { %4722 = vmatpush3.bf16.msra.mxu1 %v4721_v39 }
 0x9a6   :  { %4729 = vmatprep.subr.bf16.mxu1 %v5206_v1 }
 0x9a8   :  { %4401 = vmatmul.mubr.msk.f32.vlgmr.msra.gmra.mrb[40].mxu1 %vm222_vm3, %v5607_v6 }
 0x9a9   :  { %4422 = vmatprep.mubr.msk.f32.mxu1 %vm5205_vm0, %v5204_v0  ;;  %4731 = vmatpush3.bf16.msra.mxu1 %v4730_v53 }
 0x9aa   :  { %4732 = vmatprep.subr.bf16.mxu1 %v5206_v1 }
 0x9ad   :  { %4734 = vmatpush3.bf16.msra.mxu1 %v4733_v9 }
 0xa73   :  { %v1690_v40 = vpop.f32.mrb[36].mxu1 }
 0xa74   :  { %v4379_v41 = vpop.f32.mrb[37].mxu1  ;;  %4390 = vmatmul.mubr.msk.f32.vlgmr.msra.gmra.mrb[40].mxu0 %vm222_vm3, %v1690_v40 }
 0xa75   :  { %v1693_v16 = vpop.f32.mrb[38].mxu1  ;;  %4411 = vmatprep.mubr.msk.f32.mxu0 %vm5205_vm0, %v5204_v0  ;;  %4725 = vmatpush3.bf16.msra.mxu0 %v4724_v47  ;;  %v3857_v47 = vld [vmem:[%s6133_s4 + $0x88] sm:$0xff] }
 0xa76   :  { %v4380_v42 = vpop.f32.mrb[39].mxu1  ;;  %4726 = vmatprep.subr.bf16.mxu0 %v5206_v1 }
 0xa77   :  { %v3856_v42 = vld [vmem:[%s6133_s4 + $0x80] sm:$0xff] }
 0xa79   :  { %4728 = vmatpush3.bf16.msra.mxu0 %v4727_v50 }
 0xa7a   :  { %4735 = vmatprep.subr.bf16.mxu0 %v5206_v1 }
 0xa7b   :  { %v1845_v43 = vpop.f32.mrb[40].mxu1 }
 0xa7c   :  { %v4402_v44 = vpop.f32.mrb[41].mxu1 }
 0xb47   :  { %v1775_v54 = vpop.f32.mrb[40].mxu0 }
 0xb48   :  { %v1846_v56 = vadd.f32 %v1845_v43, %v1775_v54  ;;  %v4391_v58 = vpop.f32.mrb[41].mxu0  ;;  %v3854_v43 = vld [vmem:[%s6133_s4 + $0x70] sm:$0xff] }
 0xb4a   :  { %v1857_v57 = vadd.f32 %v3831_v55, %v1846_v56 }
 0xb4c   :  { %v3832_v59 = vmul.f32 -1.442695, %v1857_v57 }
 0xb4e   :  { %4969 = vpow2.f32 %v3832_v59 }
 0xb58   :  { %v4970_v60 = vpop.eup %4969 }
 0xb59   :  { %v1861_v61 = vadd.f32 1.0, %v4970_v60 }
 0xb5b   :  { %4971 = vrcp.f32 %v1861_v61  ;;  %v3858_v61 = vld [vmem:[%s6133_s4 + $0x90] sm:$0xff] }
 0xb65   :  { %v4972_v2 = vpop.eup %4971 }
 0xb66   :  { %v1864_v4 = vmul.f32 %v4972_v2, %v1857_v57 }
 0xb68   :  { %4412 = vmatmul.mubr.msk.f32.vlgmr.msra.gmra.mrb[42].mxu0 %vm222_vm3, %v1864_v4 }
 0xb69   :  { %4737 = vmatpush3.bf16.msra.mxu0 %v4736_v3  ;;  %4433 = vmatprep.mubr.msk.f32.mxu0 %vm5205_vm0, %v5204_v0  ;;  %v3859_v3 = vld [vmem:[%s6133_s4 + $0x98] sm:$0xff] }
 0xb6a   :  { %4738 = vmatprep.subr.bf16.mxu0 %v5206_v1 }
 0xb6d   :  { %4740 = vmatpush3.bf16.msra.mxu0 %v4739_v11 }
 0xb6e   :  { %4741 = vmatprep.subr.bf16.mxu0 %v5206_v1 }
 0xc3b   :  { %v1947_v18 = vpop.f32.mrb[42].mxu0 }
 0xc3c   :  { %v1948_v13 = vadd.f32 %v3834_v12, %v1947_v18  ;;  %v4413_v20 = vpop.f32.mrb[43].mxu0 }
 0xc3e   :  { %v5769_v21 = vadd.f32 %v1948_v13, %v5607_v6 }
 0xc40   :  { %4423 = vmatmul.mubr.msk.f32.vlgmr.msra.gmra.mrb[42].mxu1 %vm222_vm3, %v5769_v21  ;;  %4434 = vmatmul.mubr.msk.f32.vlgmr.msra.gmra.mrb[44].mxu0 %vm222_vm3, %v5769_v21 }
 0xc41   :  { %4438 = vmatprep.mubr.msk.bf16.mxu1 %vm390_vm4, %v5778_v29  ;;  %4464 = vmatprep.mubr.msk.f32.mxu0 %vm5205_vm0, %v5204_v0 }
 0xc42   :  { %4743 = vmatpush3.bf16.msra.mxu0 %v4742_v32 }
 0xc43   :  { %4744 = vmatprep.subr.bf16.mxu0 %v5206_v1 }
 0xc46   :  { %4746 = vmatpush3.bf16.msra.mxu0 %v4745_v38 }
 0xc47   :  { %4747 = vmatprep.subr.bf16.mxu0 %v5206_v1 }
 0xd13   :  { %v2026_v30 = vpop.f32.mrb[42].mxu1  ;;  %v2101_v6 = vpop.f32.mrb[44].mxu0 }
 0xd14   :  { %v2106_v31 = vpack.c.bf16 %v2101_v6, %v2101_v6  ;;  %v4424_v33 = vpop.f32.mrb[43].mxu1  ;;  %v4435_v34 = vpop.f32.mrb[45].mxu0  ;;  %v2105_v35 = vpack.c.bf16 %v2026_v30, %v2026_v30 }
 0xd16   :  { %v2108_v14 = vsel %vm144_vm1, %v2106_v31, 0  ;;  %4830 = vmatprep.subr.msk.bf16.mxu1 %vm144_vm1, %v2106_v31  ;;  %v2175_v15 = vsel %vm144_vm1, %v2105_v35, 0 }
 0xd17   :  { %4437 = vmatpush3.bf16.msra.mxu1 %v2108_v14 }
 0xd18   :  { %4831 = vmatprep.subr.msk.bf16.mxu1 %vm144_vm1, %v2105_v35 }
 0xd1a   :  { %4439 = vmatmul.mubr.msk.bf16.vlgmr.msra.gmra.mrb[44].mxu1 %vm390_vm4, %v5791_v17 }
 0xd1b   :  { %4447 = vmatpush3.bf16.msra.mxu1 %v2175_v15  ;;  %4442 = vmatprep.mubr.msk.bf16.mxu1 %vm390_vm4, %v5798_v19 }
 0xd1c   :  { %4485 = vmatprep.subr.bf16.mxu1 %v5204_v0 }
 0xd22   :  { %4443 = vmatmul.mubr.msk.bf16.gmra.mrb[48].mxu1 %vm390_vm4, %v5806_v22 }
 0xd23   :  { %4448 = vmatprep.mubr.msk.bf16.mxu1 %vm390_vm4, %v5813_v23 }
 0xd2a   :  { %4449 = vmatmul.mubr.msk.bf16.vlgmr.msra.gmra.mrb[44].mxu1 %vm390_vm4, %v5820_v24 }
 0xd2b   :  { %4452 = vmatprep.mubr.msk.bf16.mxu1 %vm390_vm4, %v5827_v25 }
 0xd32   :  { %4453 = vmatmul.mubr.msk.bf16.gmra.mrb[52].mxu1 %vm390_vm4, %v5834_v26 }
 0xd33   :  { %4493 = vmatprep.mubr.msk.bf16.mxu1 %vm5205_vm0, %v5204_v0 }
 0xdf5   :  { %v4444_v39 = vpop.f32.mrb[48].mxu1 }
 0xdf6   :  { %v2160_v40 = vpop.f32.mrb[49].mxu1 }
 0xdf7   :  { %v4445_v41 = vpop.f32.mrb[50].mxu1 }
 0xdf8   :  { %v2163_v16 = vpop.f32.mrb[51].mxu1 }
 0xdfd   :  { %v4450_v44 = vpop.f32.mrb[44].mxu1 }
 0xdfe   :  { %v5860_v45 = vadd.f32 %v4450_v44, %v3856_v42  ;;  %v2211_v46 = vpop.f32.mrb[45].mxu1 }
 0xdff   :  { %v2249_v49 = vadd.f32 %v3854_v43, %v2211_v46  ;;  %v4451_v50 = vpop.f32.mrb[46].mxu1 }
 0xe00   :  { %v3863_v51 = vmul.f32 -1.442695, %v5860_v45  ;;  %v2214_v52 = vpop.f32.mrb[47].mxu1  ;;  %v2252_v54 = vadd.f32 %v4451_v50, %v3857_v47  ;;  %v2542_v50 = vld [vmem:[#allocation6 + $0x48] sm:$0xff] }
 0xe01   :  { %v3861_v53 = vmul.f32 -1.442695, %v2249_v49  ;;  %v2250_v55 = vadd.f32 %v3855_v48, %v2214_v52 }
 0xe02   :  { %v3864_v58 = vmul.f32 -1.442695, %v2252_v54 }
 0xe03   :  { %4973 = vpow2.f32 %v3861_v53  ;;  %v3862_v56 = vmul.f32 -1.442695, %v2250_v55  ;;  %v2544_v53 = vld [vmem:[#allocation6 + $0x58] sm:$0xff] }
 0xe04   :  { %4975 = vpow2.f32 %v3863_v51  ;;  %v2543_v51 = vld [vmem:[#allocation6 + $0x50] sm:$0xff] }
 0xe05   :  { %4977 = vpow2.f32 %v3862_v56  ;;  %v4454_v57 = vpop.f32.mrb[52].mxu1 }
 0xe06   :  { %v2236_v59 = vadd.f32 %v4454_v57, %v4444_v39  ;;  %v2227_v60 = vpop.f32.mrb[53].mxu1  ;;  %4979 = vpow2.f32 %v3864_v58 }
 0xe07   :  { %v2228_v62 = vadd.f32 %v2227_v60, %v2160_v40  ;;  %v4455_v63 = vpop.f32.mrb[54].mxu1 }
 0xe08   :  { %v2230_v2 = vpop.f32.mrb[55].mxu1  ;;  %v2255_v11 = vadd.f32 %v3860_v7, %v2236_v59 }
 0xe09   :  { %v2253_v4 = vadd.f32 %v3858_v61, %v2228_v62  ;;  %v2231_v5 = vadd.f32 %v2230_v2, %v2163_v16 }
 0xe0a   :  { %v3867_v6 = vmul.f32 -1.442695, %v2255_v11 }
 0xe0b   :  { %v3865_v8 = vmul.f32 -1.442695, %v2253_v4  ;;  %v2254_v9 = vadd.f32 %v3859_v3, %v2231_v5 }
 0xe0d   :  { %v4974_v10 = vpop.eup %4973  ;;  %4981 = vpow2.f32 %v3865_v8  ;;  %v3866_v20 = vmul.f32 -1.442695, %v2254_v9 }
 0xe0e   :  { %v4976_v12 = vpop.eup %4975  ;;  %v2277_v18 = vadd.f32 1.0, %v4974_v10 }
 0xe0f   :  { %v4978_v13 = vpop.eup %4977  ;;  %v2279_v31 = vadd.f32 1.0, %v4976_v12 }
 0xe10   :  { %4983 = vrcp.f32 %v2277_v18  ;;  %v2278_v30 = vadd.f32 1.0, %v4978_v13  ;;  %v4980_v33 = vpop.eup %4979 }
 0xe11   :  { %v2280_v34 = vadd.f32 1.0, %v4980_v33 }
 0xe12   :  { %4985 = vrcp.f32 %v2278_v30 }
 0xe13   :  { %4987 = vpow2.f32 %v3866_v20 }
 0xe14   :  { %4989 = vpow2.f32 %v3867_v6 }
 0xe15   :  { %4991 = vrcp.f32 %v2279_v31 }
 0xe16   :  { %4993 = vrcp.f32 %v2280_v34 }
 0xe17   :  { %v4982_v35 = vpop.eup %4981 }
 0xe18   :  { %v2281_v15 = vadd.f32 1.0, %v4982_v35 }
 0xe1a   :  { %v4984_v14 = vpop.eup %4983  ;;  %4995 = vrcp.f32 %v2281_v15 }
 0xe1b   :  { %v2298_v27 = vmul.f32 %v4984_v14, %v2249_v49  ;;  %v2541_v49 = vld [vmem:[#allocation6 + $0x40] sm:$0xff] }
 0xe1c   :  { %v4986_v28 = vpop.eup %4985  ;;  %v4748_v52 = vpack.c.bf16 %v2542_v50, %v2541_v49 }
 0xe1d   :  { %v4988_v32 = vpop.eup %4987  ;;  %4465 = vmatmul.mubr.msk.f32.vlgmr.msra.gmra.mrb[46].mxu0 %vm222_vm3, %v2298_v27  ;;  %v2299_v38 = vmul.f32 %v4986_v28, %v2250_v55  ;;  %v3872_v55 = vld [vmem:[#allocation4 + $0x2] ss:$0 sm:$0xff] }
 0xe1e   :  { %v2282_v36 = vadd.f32 1.0, %v4988_v32  ;;  %4467 = vmatprep.mubr.msk.f32.mxu0 %vm5205_vm0, %v5204_v0  ;;  %v4990_v37 = vpop.eup %4989  ;;  %4749 = vmatpush3.bf16.msra.mxu0 %v4748_v52 }
 0xe1f   :  { %v4992_v39 = vpop.eup %4991  ;;  %v2283_v40 = vadd.f32 1.0, %v4990_v37  ;;  %4750 = vmatprep.subr.bf16.mxu0 %v5206_v1 }
 0xe20   :  { %4997 = vrcp.f32 %v2282_v36  ;;  %v2300_v41 = vmul.f32 %v4992_v39, %v5860_v45  ;;  %v4994_v16 = vpop.eup %4993 }
 0xe21   :  { %4468 = vmatmul.mubr.msk.f32.gmra.mrb[48].mxu0 %vm222_vm3, %v2299_v38  ;;  %4999 = vrcp.f32 %v2283_v40  ;;  %v2301_v42 = vmul.f32 %v4994_v16, %v2252_v54  ;;  %v4751_v54 = vpack.c.bf16 %v2544_v53, %v2543_v51 }
 0xe22   :  { %4470 = vmatprep.mubr.msk.f32.mxu0 %vm5205_vm0, %v5204_v0 }
 0xe23   :  { %4752 = vmatpush3.bf16.msra.mxu0 %v4751_v54 }
 0xe24   :  { %v4996_v43 = vpop.eup %4995  ;;  %4759 = vmatprep.subr.bf16.mxu0 %v5206_v1 }
 0xe25   :  { %4471 = vmatmul.mubr.msk.f32.gmra.mrb[50].mxu0 %vm222_vm3, %v2300_v41  ;;  %v2302_v44 = vmul.f32 %v4996_v43, %v2253_v4 }
 0xe26   :  { %4473 = vmatprep.mubr.msk.f32.mxu0 %vm5205_vm0, %v5204_v0 }
 0xe29   :  { %4474 = vmatmul.mubr.msk.f32.gmra.mrb[52].mxu0 %vm222_vm3, %v2301_v42 }
 0xe2a   :  { %4476 = vmatprep.mubr.msk.f32.mxu0 %vm5205_vm0, %v5204_v0  ;;  %v4998_v46 = vpop.eup %4997 }
 0xe2b   :  { %v2303_v45 = vmul.f32 %v4998_v46, %v2254_v9  ;;  %v5000_v47 = vpop.eup %4999 }
 0xe2c   :  { %v2304_v48 = vmul.f32 %v5000_v47, %v2255_v11 }
 0xe2d   :  { %4477 = vmatmul.mubr.msk.f32.gmra.mrb[54].mxu0 %vm222_vm3, %v2302_v44 }
 0xe2e   :  { %4479 = vmatprep.mubr.msk.f32.mxu0 %vm5205_vm0, %v5204_v0 }
 0xe31   :  { %4480 = vmatmul.mubr.msk.f32.gmra.mrb[56].mxu0 %vm222_vm3, %v2303_v45 }
 0xe32   :  { %4482 = vmatprep.mubr.msk.f32.mxu0 %vm5205_vm0, %v5204_v0 }
 0xe35   :  { %4483 = vmatmul.mubr.msk.f32.gmra.mrb[58].mxu0 %vm222_vm3, %v2304_v48 }
 0xe36   :  { %4505 = vmatprep.mubr.msk.f32.mxu0 %vm5205_vm0, %v5204_v0 }
 0xef0   :  { %v2405_v56 = vpop.f32.mrb[46].mxu0 }
 0xef1   :  { %v2406_v58 = vadd.f32 %v3872_v55, %v2405_v56  ;;  %v4466_v57 = vpop.f32.mrb[47].mxu0 }
 0xef3   :  { %v3880_v59 = vmul.f32 -1.442695, %v2406_v58 }
 0xef4   :  { %v2410_v60 = vpop.f32.mrb[48].mxu0 }
 0xef5   :  { %5001 = vpow2.f32 %v3880_v59  ;;  %v2411_v61 = vadd.f32 %v3872_v55, %v2410_v60  ;;  %v4469_v62 = vpop.f32.mrb[49].mxu0 }
 0xef7   :  { %v3881_v63 = vmul.f32 -1.442695, %v2411_v61 }
 0xef8   :  { %v2415_v2 = vpop.f32.mrb[50].mxu0 }
 0xef9   :  { %5003 = vpow2.f32 %v3881_v63  ;;  %v2416_v3 = vadd.f32 %v3872_v55, %v2415_v2  ;;  %v4472_v4 = vpop.f32.mrb[51].mxu0  ;;  %v3888_v63 = vld [vmem:[%s6143_s14 + $0x40] sm:$0xff]  ;;  %v3889_v2 = vld [vmem:[%s6143_s14 + $0x48] sm:$0xff] }
 0xefa   :  { %v4754_v4 = vpack.c.bf16 %v3889_v2, %v3888_v63 }
 0xefb   :  { %v3882_v5 = vmul.f32 -1.442695, %v2416_v3 }
 0xefc   :  { %v2420_v7 = vpop.f32.mrb[52].mxu0 }
 0xefd   :  { %5005 = vpow2.f32 %v3882_v5  ;;  %v2421_v8 = vadd.f32 %v3872_v55, %v2420_v7  ;;  %v4475_v9 = vpop.f32.mrb[53].mxu0  ;;  %v3890_v5 = vld [vmem:[%s6143_s14 + $0x50] sm:$0xff]  ;;  %v3891_v7 = vld [vmem:[%s6143_s14 + $0x58] sm:$0xff] }
 0xefe   :  { %v4757_v9 = vpack.c.bf16 %v3891_v7, %v3890_v5  ;;  %v3918_v5 = vld [vmem:[%s6133_s4 + $0xa8] sm:$0xff] }
 0xeff   :  { %v5002_v10 = vpop.eup %5001  ;;  %v3883_v11 = vmul.f32 -1.442695, %v2421_v8 }
 0xf00   :  { %v2460_v12 = vadd.f32 1.0, %v5002_v10  ;;  %v2425_v18 = vpop.f32.mrb[54].mxu0 }
 0xf01   :  { %5007 = vpow2.f32 %v3883_v11  ;;  %v2426_v13 = vadd.f32 %v3872_v55, %v2425_v18  ;;  %v4478_v20 = vpop.f32.mrb[55].mxu0 }
 0xf02   :  { %5009 = vrcp.f32 %v2460_v12 }
 0xf03   :  { %v5004_v30 = vpop.eup %5003  ;;  %v3884_v6 = vmul.f32 -1.442695, %v2426_v13 }
 0xf04   :  { %v2461_v31 = vadd.f32 1.0, %v5004_v30  ;;  %v2430_v33 = vpop.f32.mrb[56].mxu0  ;;  %v2705_v30 = vld [vmem:[#allocation7 + $0x40] sm:$0xff] }
 0xf05   :  { %5011 = vpow2.f32 %v3884_v6  ;;  %v2431_v34 = vadd.f32 %v3872_v55, %v2430_v33  ;;  %v4481_v35 = vpop.f32.mrb[57].mxu0  ;;  %v2706_v6 = vld [vmem:[#allocation7 + $0x48] sm:$0xff]  ;;  %v2707_v33 = vld [vmem:[#allocation7 + $0x50] sm:$0xff] }
 0xf06   :  { %5013 = vrcp.f32 %v2461_v31  ;;  %v4760_v31 = vpack.c.bf16 %v2706_v6, %v2705_v30 }
 0xf07   :  { %v5006_v14 = vpop.eup %5005  ;;  %v3885_v15 = vmul.f32 -1.442695, %v2431_v34 }
 0xf08   :  { %v2462_v27 = vadd.f32 1.0, %v5006_v14  ;;  %v2435_v28 = vpop.f32.mrb[58].mxu0  ;;  %v3900_v14 = vld [vmem:[%s6139_s10 + $0x60] sm:$0xff] }
 0xf09   :  { %5015 = vpow2.f32 %v3885_v15  ;;  %v2436_v32 = vadd.f32 %v3872_v55, %v2435_v28  ;;  %v4484_v36 = vpop.f32.mrb[59].mxu0  ;;  %v3901_v15 = vld [vmem:[%s6139_s10 + $0x68] sm:$0xff] }
 0xf0a   :  { %5017 = vrcp.f32 %v2462_v27  ;;  %v4766_v27 = vpack.c.bf16 %v3901_v15, %v3900_v14 }
 0xf0b   :  { %v5008_v37 = vpop.eup %5007  ;;  %v3886_v38 = vmul.f32 -1.442695, %v2436_v32 }
 0xf0c   :  { %v2463_v39 = vadd.f32 1.0, %v5008_v37  ;;  %v5010_v40 = vpop.eup %5009 }
 0xf0d   :  { %5019 = vpow2.f32 %v3886_v38  ;;  %v2481_v43 = vmul.f32 %v5010_v40, %v2406_v58 }
 0xf0e   :  { %5021 = vrcp.f32 %v2463_v39 }
 0xf0f   :  { %v5012_v41 = vpop.eup %5011 }
 0xf10   :  { %v5014_v16 = vpop.eup %5013  ;;  %v2464_v42 = vadd.f32 1.0, %v5012_v41 }
 0xf11   :  { %v2482_v44 = vmul.f32 %v5014_v16, %v2411_v61  ;;  %v3905_v16 = vld [vmem:[%s6140_s11 + $0x60] sm:$0xff] }
 0xf12   :  { %5023 = vrcp.f32 %v2464_v42  ;;  %v3906_v42 = vld [vmem:[%s6140_s11 + $0x68] sm:$0xff] }
 0xf13   :  { %v5016_v46 = vpop.eup %5015  ;;  %v2488_v45 = vpack.c.bf16 %v2482_v44, %v2481_v43  ;;  %v4772_v44 = vpack.c.bf16 %v3906_v42, %v3905_v16 }
 0xf14   :  { %v2465_v47 = vadd.f32 1.0, %v5016_v46  ;;  %v5018_v48 = vpop.eup %5017 }
 0xf15   :  { %4486 = vmatpush3.bf16.msra.mxu1 %v2488_v45  ;;  %v2483_v52 = vmul.f32 %v5018_v48, %v2416_v3  ;;  %v3902_v45 = vld [vmem:[%s6139_s10 + $0x70] sm:$0xff] }
 0xf16   :  { %5025 = vrcp.f32 %v2465_v47  ;;  %4487 = vmatprep.subr.bf16.mxu1 %v5204_v0  ;;  %v3903_v47 = vld [vmem:[%s6139_s10 + $0x78] sm:$0xff]  ;;  %v3907_v48 = vld [vmem:[%s6140_s11 + $0x70] sm:$0xff] }
 0xf17   :  { %v5020_v49 = vpop.eup %5019 }
 0xf18   :  { %v5022_v50 = vpop.eup %5021  ;;  %v2466_v51 = vadd.f32 1.0, %v5020_v49  ;;  %v4769_v49 = vpack.c.bf16 %v3903_v47, %v3902_v45 }
 0xf19   :  { %v2484_v53 = vmul.f32 %v5022_v50, %v2421_v8  ;;  %v5922_v8 = vld [vmem:[%s6159_s2] sm:$0xf]  ;;  %v3908_v50 = vld [vmem:[%s6140_s11 + $0x78] sm:$0xff] }
 0xf1a   :  { %5027 = vrcp.f32 %v2466_v51  ;;  %v4775_v51 = vpack.c.bf16 %v3908_v50, %v3907_v48 }
 0xf1b   :  { %v2489_v54 = vpack.c.bf16 %v2484_v53, %v2483_v52  ;;  %v3898_v52 = vld [vmem:[%s6147_s18 + $0x2] ss:$0 sm:$0xff] }
 0xf1c   :  { %v5024_v55 = vpop.eup %5023 }
 0xf1d   :  { %4488 = vmatpush3.bf16.msra.mxu1 %v2489_v54  ;;  %v2485_v58 = vmul.f32 %v5024_v55, %v2426_v13 }
 0xf1e   :  { %4489 = vmatprep.subr.bf16.mxu1 %v5204_v0 }
 0xf20   :  { %v5026_v56 = vpop.eup %5025 }
 0xf21   :  { %v2486_v57 = vmul.f32 %v5026_v56, %v2431_v34  ;;  %v2708_v34 = vld [vmem:[#allocation7 + $0x58] sm:$0xff] }
 0xf22   :  { %v4763_v35 = vpack.c.bf16 %v2708_v34, %v2707_v33 }
 0xf23   :  { %v2490_v59 = vpack.c.bf16 %v2486_v57, %v2485_v58 }
 0xf24   :  { %v5028_v60 = vpop.eup %5027 }
 0xf25   :  { %v2487_v61 = vmul.f32 %v5028_v60, %v2436_v32  ;;  %4490 = vmatpush3.bf16.msra.mxu1 %v2490_v59  ;;  %v3895_v32 = vld [vmem:[%s6145_s16 + $0x2] ss:$0 sm:$0xff] }
 0xf26   :  { %4491 = vmatprep.subr.bf16.mxu1 %v5204_v0 }
 0xf27   :  { %v2491_v62 = vpack.c.bf16 %v2487_v61, %v2487_v61 }
 0xf29   :  { %v2493_v3 = vsel %vm144_vm1, %v2491_v62, 0 }
 0xf2a   :  { %4492 = vmatpush3.bf16.msra.mxu1 %v2493_v3 }
 0xf2b   :  { %4753 = vmatprep.subr.bf16.mxu1 %v5206_v1 }
 0xf2d   :  { %4494 = vmatmul.mubr.msk.bf16.vlgmr.msra.gmra.mrb[56].mxu1 %vm815_vm5, %v5922_v8 }
 0xf2e   :  { %4755 = vmatpush3.bf16.msra.mxu1 %v4754_v4  ;;  %4516 = vmatprep.mubr.msk.f32.mxu1 %vm5205_vm0, %v5204_v0  ;;  %v3920_v4 = vld [vmem:[%s6133_s4 + $0xb8] sm:$0xff] }
 0xf2f   :  { %4756 = vmatprep.subr.bf16.mxu1 %v5206_v1 }
 0xf32   :  { %4758 = vmatpush3.bf16.msra.mxu1 %v4757_v9 }
 0xf33   :  { %4765 = vmatprep.subr.bf16.mxu1 %v5206_v1 }
 0xf35   :  { %4517 = vmatmul.mubr.msk.f32.vlgmr.msra.gmra.mrb[60].mxu1 %vm222_vm3, %v5769_v21 }
 0xf36   :  { %4538 = vmatprep.mubr.msk.f32.mxu1 %vm5205_vm0, %v5204_v0  ;;  %4767 = vmatpush3.bf16.msra.mxu1 %v4766_v27 }
 0xf37   :  { %4768 = vmatprep.subr.bf16.mxu1 %v5206_v1 }
 0xf3a   :  { %4770 = vmatpush3.bf16.msra.mxu1 %v4769_v49 }
0x1000   :  { %v2529_v10 = vpop.f32.mrb[56].mxu1 }
0x1001   :  { %v4495_v11 = vpop.f32.mrb[57].mxu1  ;;  %4506 = vmatmul.mubr.msk.f32.vlgmr.msra.gmra.mrb[60].mxu0 %vm222_vm3, %v2529_v10 }
0x1002   :  { %v2532_v12 = vpop.f32.mrb[58].mxu1  ;;  %4527 = vmatprep.mubr.msk.f32.mxu0 %vm5205_vm0, %v5204_v0  ;;  %4761 = vmatpush3.bf16.msra.mxu0 %v4760_v31  ;;  %v3921_v11 = vld [vmem:[%s6133_s4 + $0xc0] sm:$0xff] }
0x1003   :  { %v4496_v18 = vpop.f32.mrb[59].mxu1  ;;  %4762 = vmatprep.subr.bf16.mxu0 %v5206_v1  ;;  %v3919_v12 = vld [vmem:[%s6133_s4 + $0xb0] sm:$0xff] }
0x1006   :  { %4764 = vmatpush3.bf16.msra.mxu0 %v4763_v35 }
0x1007   :  { %4771 = vmatprep.subr.bf16.mxu0 %v5206_v1 }
0x1008   :  { %v2684_v13 = vpop.f32.mrb[60].mxu1 }
0x1009   :  { %v4518_v20 = vpop.f32.mrb[61].mxu1 }
0x10d4   :  { %v2614_v28 = vpop.f32.mrb[60].mxu0 }
0x10d5   :  { %v2685_v36 = vadd.f32 %v2684_v13, %v2614_v28  ;;  %v4507_v37 = vpop.f32.mrb[61].mxu0  ;;  %v3922_v28 = vld [vmem:[%s6133_s4 + $0xc8] sm:$0xff] }
0x10d7   :  { %v2696_v38 = vadd.f32 %v3895_v32, %v2685_v36 }
0x10d9   :  { %v3896_v39 = vmul.f32 -1.442695, %v2696_v38 }
0x10db   :  { %5029 = vpow2.f32 %v3896_v39 }
0x10e5   :  { %v5030_v40 = vpop.eup %5029 }
0x10e6   :  { %v2700_v41 = vadd.f32 1.0, %v5030_v40 }
0x10e8   :  { %5031 = vrcp.f32 %v2700_v41  ;;  %v3924_v41 = vld [vmem:[%s6133_s4 + $0xd8] sm:$0xff] }
0x10f2   :  { %v5032_v43 = vpop.eup %5031 }
0x10f3   :  { %v2703_v46 = vmul.f32 %v5032_v43, %v2696_v38  ;;  %v3923_v38 = vld [vmem:[%s6133_s4 + $0xd0] sm:$0xff] }
0x10f5   :  { %4528 = vmatmul.mubr.msk.f32.vlgmr.msra.gmra.mrb[62].mxu0 %vm222_vm3, %v2703_v46 }
0x10f6   :  { %4773 = vmatpush3.bf16.msra.mxu0 %v4772_v44  ;;  %4549 = vmatprep.mubr.msk.f32.mxu0 %vm5205_vm0, %v5204_v0 }
0x10f7   :  { %4774 = vmatprep.subr.bf16.mxu0 %v5206_v1 }
0x10fa   :  { %4776 = vmatpush3.bf16.msra.mxu0 %v4775_v51 }
0x10fb   :  { %4777 = vmatprep.subr.bf16.mxu0 %v5206_v1 }
0x11c8   :  { %v2786_v53 = vpop.f32.mrb[62].mxu0 }
0x11c9   :  { %v2787_v54 = vadd.f32 %v3898_v52, %v2786_v53  ;;  %v4529_v55 = vpop.f32.mrb[63].mxu0 }
0x11cb   :  { %v5976_v56 = vadd.f32 %v2787_v54, %v5769_v21 }
0x11cd   :  { %4539 = vmatmul.mubr.msk.f32.vlgmr.msra.gmra.mrb[62].mxu1 %vm222_vm3, %v5976_v56  ;;  %4550 = vmatmul.mubr.msk.f32.vlgmr.msra.gmra.mrb[64].mxu0 %vm222_vm3, %v5976_v56 }
0x11ce   :  { %4554 = vmatprep.mubr.msk.bf16.mxu1 %vm390_vm4, %v5778_v29  ;;  %4580 = vmatprep.mubr.msk.f32.mxu0 %vm5205_vm0, %v5204_v0  ;;  %v3932_v29 = vld [vmem:[%s6141_s12 + $0x60] sm:$0xff] }
0x12a0   :  { %v2865_v58 = vpop.f32.mrb[62].mxu1  ;;  %v2940_v57 = vpop.f32.mrb[64].mxu0 }
0x12a1   :  { %v2945_v59 = vpack.c.bf16 %v2940_v57, %v2940_v57  ;;  %v4540_v60 = vpop.f32.mrb[63].mxu1  ;;  %v4551_v61 = vpop.f32.mrb[65].mxu0  ;;  %v2944_v62 = vpack.c.bf16 %v2865_v58, %v2865_v58 }
0x12a3   :  { %v2947_v21 = vsel %vm144_vm1, %v2945_v59, 0  ;;  %4832 = vmatprep.subr.msk.bf16.mxu1 %vm144_vm1, %v2945_v59  ;;  %v3014_v63 = vsel %vm144_vm1, %v2944_v62, 0 }
0x12a4   :  { %4553 = vmatpush3.bf16.msra.mxu1 %v2947_v21 }
0x12a5   :  { %4833 = vmatprep.subr.msk.bf16.mxu1 %vm144_vm1, %v2944_v62 }
0x12a7   :  { %4555 = vmatmul.mubr.msk.bf16.vlgmr.msra.gmra.mrb[64].mxu1 %vm390_vm4, %v5791_v17  ;;  %v3933_v17 = vld [vmem:[%s6141_s12 + $0x68] sm:$0xff] }
0x12a8   :  { %4563 = vmatpush3.bf16.msra.mxu1 %v3014_v63  ;;  %4558 = vmatprep.mubr.msk.bf16.mxu1 %vm390_vm4, %v5798_v19  ;;  %v4778_v19 = vpack.c.bf16 %v3933_v17, %v3932_v29 }
0x12a9   :  { %4601 = vmatprep.subr.bf16.mxu1 %v5204_v0 }
0x12aa   :  { %4779 = vmatpush3.bf16.msra.mxu0 %v4778_v19 }
0x12ab   :  { %4780 = vmatprep.subr.bf16.mxu0 %v5206_v1 }
0x12af   :  { %4559 = vmatmul.mubr.msk.bf16.gmra.mrb[68].mxu1 %vm390_vm4, %v5806_v22  ;;  %v3934_v22 = vld [vmem:[%s6141_s12 + $0x70] sm:$0xff] }
0x12b0   :  { %4564 = vmatprep.mubr.msk.bf16.mxu1 %vm390_vm4, %v5813_v23  ;;  %v3935_v23 = vld [vmem:[%s6141_s12 + $0x78] sm:$0xff] }
0x12b7   :  { %4565 = vmatmul.mubr.msk.bf16.vlgmr.msra.gmra.mrb[64].mxu1 %vm390_vm4, %v5820_v24  ;;  %v4781_v24 = vpack.c.bf16 %v3935_v23, %v3934_v22 }
0x12b8   :  { %4568 = vmatprep.mubr.msk.bf16.mxu1 %vm390_vm4, %v5827_v25 }
0x12b9   :  { %4782 = vmatpush3.bf16.msra.mxu0 %v4781_v24 }
0x12ba   :  { %4783 = vmatprep.subr.bf16.mxu0 %v5206_v1 }
0x12bf   :  { %4569 = vmatmul.mubr.msk.bf16.gmra.mrb[72].mxu1 %vm390_vm4, %v5834_v26 }
0x12c0   :  { %4609 = vmatprep.mubr.msk.bf16.mxu1 %vm5205_vm0, %v5204_v0 }
0x1382   :  { %v4560_v25 = vpop.f32.mrb[68].mxu1 }
0x1383   :  { %v2999_v26 = vpop.f32.mrb[69].mxu1 }
0x1384   :  { %v4561_v2 = vpop.f32.mrb[70].mxu1 }
0x1385   :  { %v3002_v3 = vpop.f32.mrb[71].mxu1 }
0x138a   :  { %v4566_v7 = vpop.f32.mrb[64].mxu1 }
0x138b   :  { %v6027_v9 = vadd.f32 %v4566_v7, %v3920_v4  ;;  %v3050_v10 = vpop.f32.mrb[65].mxu1  ;;  %v3380_v4 = vld [vmem:[#allocation6 + $0x60] sm:$0xff]  ;;  %v3382_v7 = vld [vmem:[#allocation6 + $0x70] sm:$0xff] }
0x138c   :  { %v3088_v18 = vadd.f32 %v3918_v5, %v3050_v10  ;;  %v4567_v13 = vpop.f32.mrb[66].mxu1  ;;  %v3381_v5 = vld [vmem:[#allocation6 + $0x68] sm:$0xff]  ;;  %v3383_v10 = vld [vmem:[#allocation6 + $0x78] sm:$0xff] }
0x138d   :  { %v3927_v20 = vmul.f32 -1.442695, %v6027_v9  ;;  %v3053_v30 = vpop.f32.mrb[67].mxu1  ;;  %v3091_v31 = vadd.f32 %v4567_v13, %v3921_v11  ;;  %v4787_v11 = vpack.c.bf16 %v3383_v10, %v3382_v7 }
0x138e   :  { %v3925_v6 = vmul.f32 -1.442695, %v3088_v18  ;;  %v3089_v33 = vadd.f32 %v3919_v12, %v3053_v30  ;;  %v3936_v12 = vld [vmem:[#allocation4 + $0x3] ss:$0 sm:$0xff] }
0x138f   :  { %v3928_v35 = vmul.f32 -1.442695, %v3091_v31 }
0x1390   :  { %5033 = vpow2.f32 %v3925_v6  ;;  %v3926_v34 = vmul.f32 -1.442695, %v3089_v33 }
0x1391   :  { %5035 = vpow2.f32 %v3927_v20 }
0x1392   :  { %5037 = vpow2.f32 %v3926_v34  ;;  %v4570_v14 = vpop.f32.mrb[72].mxu1 }
0x1393   :  { %v3075_v15 = vadd.f32 %v4570_v14, %v4560_v25  ;;  %v3066_v27 = vpop.f32.mrb[73].mxu1  ;;  %5039 = vpow2.f32 %v3928_v35 }
0x1394   :  { %v3067_v32 = vadd.f32 %v3066_v27, %v2999_v26  ;;  %v4571_v36 = vpop.f32.mrb[74].mxu1 }
0x1395   :  { %v3069_v37 = vpop.f32.mrb[75].mxu1  ;;  %v3094_v44 = vadd.f32 %v3924_v41, %v3075_v15 }
0x1396   :  { %v3092_v39 = vadd.f32 %v3922_v28, %v3067_v32  ;;  %v3070_v40 = vadd.f32 %v3069_v37, %v3002_v3 }
0x1397   :  { %v3931_v50 = vmul.f32 -1.442695, %v3094_v44 }
0x1398   :  { %v3929_v16 = vmul.f32 -1.442695, %v3092_v39  ;;  %v3093_v42 = vadd.f32 %v3923_v38, %v3070_v40 }
0x139a   :  { %v5034_v43 = vpop.eup %5033  ;;  %5041 = vpow2.f32 %v3929_v16  ;;  %v3930_v48 = vmul.f32 -1.442695, %v3093_v42 }
0x139b   :  { %v5036_v46 = vpop.eup %5035  ;;  %v3116_v45 = vadd.f32 1.0, %v5034_v43 }
0x139c   :  { %v5038_v47 = vpop.eup %5037  ;;  %v3118_v51 = vadd.f32 1.0, %v5036_v46 }
0x139d   :  { %5043 = vrcp.f32 %v3116_v45  ;;  %v3117_v49 = vadd.f32 1.0, %v5038_v47  ;;  %v5040_v52 = vpop.eup %5039 }
0x139e   :  { %v3119_v53 = vadd.f32 1.0, %v5040_v52 }
0x139f   :  { %5045 = vrcp.f32 %v3117_v49 }
0x13a0   :  { %5047 = vpow2.f32 %v3930_v48 }
0x13a1   :  { %5049 = vpow2.f32 %v3931_v50 }
0x13a2   :  { %5051 = vrcp.f32 %v3118_v51 }
0x13a3   :  { %5053 = vrcp.f32 %v3119_v53 }
0x13a4   :  { %v5042_v54 = vpop.eup %5041 }
0x13a5   :  { %v3120_v58 = vadd.f32 1.0, %v5042_v54 }
0x13a7   :  { %v5044_v55 = vpop.eup %5043  ;;  %5055 = vrcp.f32 %v3120_v58 }
0x13a8   :  { %v3137_v57 = vmul.f32 %v5044_v55, %v3088_v18 }
0x13a9   :  { %v5046_v59 = vpop.eup %5045 }
0x13aa   :  { %v5048_v60 = vpop.eup %5047  ;;  %4581 = vmatmul.mubr.msk.f32.vlgmr.msra.gmra.mrb[66].mxu0 %vm222_vm3, %v3137_v57  ;;  %v3138_v21 = vmul.f32 %v5046_v59, %v3089_v33 }
0x13ab   :  { %v3121_v61 = vadd.f32 1.0, %v5048_v60  ;;  %4583 = vmatprep.mubr.msk.f32.mxu0 %vm5205_vm0, %v5204_v0  ;;  %v5050_v62 = vpop.eup %5049 }
0x13ac   :  { %v5052_v63 = vpop.eup %5051  ;;  %v3122_v29 = vadd.f32 1.0, %v5050_v62 }
0x13ad   :  { %5057 = vrcp.f32 %v3121_v61  ;;  %v3139_v17 = vmul.f32 %v5052_v63, %v6027_v9  ;;  %v5054_v19 = vpop.eup %5053  ;;  %v4784_v9 = vpack.c.bf16 %v3381_v5, %v3380_v4 }
0x13ae   :  { %4584 = vmatmul.mubr.msk.f32.gmra.mrb[68].mxu0 %vm222_vm3, %v3138_v21  ;;  %5059 = vrcp.f32 %v3122_v29  ;;  %v3140_v22 = vmul.f32 %v5054_v19, %v3091_v31 }
0x13af   :  { %4586 = vmatprep.mubr.msk.f32.mxu0 %vm5205_vm0, %v5204_v0  ;;  %4785 = vmatpush3.bf16.msra.mxu0 %v4784_v9 }
0x13b0   :  { %4786 = vmatprep.subr.bf16.mxu0 %v5206_v1 }
0x13b1   :  { %v5056_v23 = vpop.eup %5055 }
0x13b2   :  { %4587 = vmatmul.mubr.msk.f32.gmra.mrb[70].mxu0 %vm222_vm3, %v3139_v17  ;;  %v3141_v24 = vmul.f32 %v5056_v23, %v3092_v39 }
0x13b3   :  { %4589 = vmatprep.mubr.msk.f32.mxu0 %vm5205_vm0, %v5204_v0  ;;  %4788 = vmatpush3.bf16.msra.mxu0 %v4787_v11 }
0x13b4   :  { %4795 = vmatprep.subr.bf16.mxu0 %v5206_v1 }
0x13b6   :  { %4590 = vmatmul.mubr.msk.f32.gmra.mrb[72].mxu0 %vm222_vm3, %v3140_v22 }
0x13b7   :  { %4592 = vmatprep.mubr.msk.f32.mxu0 %vm5205_vm0, %v5204_v0  ;;  %v5058_v25 = vpop.eup %5057 }
0x13b8   :  { %v3142_v26 = vmul.f32 %v5058_v25, %v3093_v42  ;;  %v5060_v2 = vpop.eup %5059 }
0x13b9   :  { %v3143_v3 = vmul.f32 %v5060_v2, %v3094_v44 }
0x13ba   :  { %4593 = vmatmul.mubr.msk.f32.gmra.mrb[74].mxu0 %vm222_vm3, %v3141_v24 }
0x13bb   :  { %4595 = vmatprep.mubr.msk.f32.mxu0 %vm5205_vm0, %v5204_v0 }
0x13be   :  { %4596 = vmatmul.mubr.msk.f32.gmra.mrb[76].mxu0 %vm222_vm3, %v3142_v26 }
0x13bf   :  { %4598 = vmatprep.mubr.msk.f32.mxu0 %vm5205_vm0, %v5204_v0 }
0x13c2   :  { %4599 = vmatmul.mubr.msk.f32.gmra.mrb[78].mxu0 %vm222_vm3, %v3143_v3 }
0x13c3   :  { %4621 = vmatprep.mubr.msk.f32.mxu0 %vm5205_vm0, %v5204_v0 }
0x147d   :  { %v3244_v18 = vpop.f32.mrb[66].mxu0 }
0x147e   :  { %v3245_v13 = vadd.f32 %v3936_v12, %v3244_v18  ;;  %v4582_v20 = vpop.f32.mrb[67].mxu0  ;;  %v3952_v18 = vld [vmem:[%s6143_s14 + $0x60] sm:$0xff] }
0x1480   :  { %v3944_v30 = vmul.f32 -1.442695, %v3245_v13 }
0x1481   :  { %v3249_v6 = vpop.f32.mrb[68].mxu0 }
0x1482   :  { %5061 = vpow2.f32 %v3944_v30  ;;  %v3250_v31 = vadd.f32 %v3936_v12, %v3249_v6  ;;  %v4585_v33 = vpop.f32.mrb[69].mxu0  ;;  %v3954_v6 = vld [vmem:[%s6143_s14 + $0x70] sm:$0xff] }
0x1484   :  { %v3945_v34 = vmul.f32 -1.442695, %v3250_v31 }
0x1485   :  { %v3254_v35 = vpop.f32.mrb[70].mxu0 }
0x1486   :  { %5063 = vpow2.f32 %v3945_v34  ;;  %v3255_v14 = vadd.f32 %v3936_v12, %v3254_v35  ;;  %v4588_v15 = vpop.f32.mrb[71].mxu0 }
0x1488   :  { %v3946_v27 = vmul.f32 -1.442695, %v3255_v14 }
0x1489   :  { %v3259_v28 = vpop.f32.mrb[72].mxu0 }
0x148a   :  { %5065 = vpow2.f32 %v3946_v27  ;;  %v3260_v32 = vadd.f32 %v3936_v12, %v3259_v28  ;;  %v4591_v36 = vpop.f32.mrb[73].mxu0  ;;  %v3544_v28 = vld [vmem:[#allocation7 + $0x60] sm:$0xff] }
0x148c   :  { %v5062_v37 = vpop.eup %5061  ;;  %v3947_v38 = vmul.f32 -1.442695, %v3260_v32 }
0x148d   :  { %v3299_v39 = vadd.f32 1.0, %v5062_v37  ;;  %v3264_v40 = vpop.f32.mrb[74].mxu0  ;;  %v3546_v37 = vld [vmem:[#allocation7 + $0x70] sm:$0xff] }
0x148e   :  { %5067 = vpow2.f32 %v3947_v38  ;;  %v3265_v41 = vadd.f32 %v3936_v12, %v3264_v40  ;;  %v4594_v16 = vpop.f32.mrb[75].mxu0  ;;  %v3547_v38 = vld [vmem:[#allocation7 + $0x78] sm:$0xff]  ;;  %v3630_v40 = vld [vmem:[%s6137_s8] sm:$0xff] }
0x148f   :  { %5069 = vrcp.f32 %v3299_v39  ;;  %v4799_v39 = vpack.c.bf16 %v3547_v38, %v3546_v37 }
0x1490   :  { %v5064_v42 = vpop.eup %5063  ;;  %v3948_v43 = vmul.f32 -1.442695, %v3265_v41 }
0x1491   :  { %v3300_v44 = vadd.f32 1.0, %v5064_v42  ;;  %v3269_v46 = vpop.f32.mrb[76].mxu0  ;;  %v3959_v42 = vld [vmem:[%s6145_s16 + $0x3] ss:$0 sm:$0xff] }
0x1492   :  { %5071 = vpow2.f32 %v3948_v43  ;;  %v3270_v45 = vadd.f32 %v3936_v12, %v3269_v46  ;;  %v4597_v47 = vpop.f32.mrb[77].mxu0 }
0x1493   :  { %5073 = vrcp.f32 %v3300_v44 }
0x1494   :  { %v5066_v48 = vpop.eup %5065  ;;  %v3949_v49 = vmul.f32 -1.442695, %v3270_v45 }
0x1495   :  { %v3301_v50 = vadd.f32 1.0, %v5066_v48  ;;  %v3274_v51 = vpop.f32.mrb[78].mxu0 }
0x1496   :  { %5075 = vpow2.f32 %v3949_v49  ;;  %v3275_v52 = vadd.f32 %v3936_v12, %v3274_v51  ;;  %v4600_v53 = vpop.f32.mrb[79].mxu0  ;;  %v3633_v51 = vld [vmem:[%s6137_s8 + $0x18] sm:$0xff] }
0x1497   :  { %5077 = vrcp.f32 %v3301_v50  ;;  %v3962_v53 = vld [vmem:[%s6147_s18 + $0x3] ss:$0 sm:$0xff] }
0x1498   :  { %v5068_v54 = vpop.eup %5067  ;;  %v3950_v55 = vmul.f32 -1.442695, %v3275_v52 }
0x1499   :  { %v3302_v58 = vadd.f32 1.0, %v5068_v54  ;;  %v5070_v57 = vpop.eup %5069 }
0x149a   :  { %5079 = vpow2.f32 %v3950_v55  ;;  %v3320_v62 = vmul.f32 %v5070_v57, %v3245_v13  ;;  %v3953_v13 = vld [vmem:[%s6143_s14 + $0x68] sm:$0xff] }
0x149b   :  { %5081 = vrcp.f32 %v3302_v58  ;;  %v4790_v30 = vpack.c.bf16 %v3953_v13, %v3952_v18 }
0x149c   :  { %v5072_v59 = vpop.eup %5071 }
0x149d   :  { %v5074_v60 = vpop.eup %5073  ;;  %v3303_v61 = vadd.f32 1.0, %v5072_v59  ;;  %v3964_v59 = vld [vmem:[%s6138_s9] ss:$0 sm:$0xff] }
0x149e   :  { %v3321_v21 = vmul.f32 %v5074_v60, %v3250_v31  ;;  %v3955_v31 = vld [vmem:[%s6143_s14 + $0x78] sm:$0xff] }
0x149f   :  { %5083 = vrcp.f32 %v3303_v61  ;;  %v4793_v33 = vpack.c.bf16 %v3955_v31, %v3954_v6 }
0x14a0   :  { %v5076_v63 = vpop.eup %5075  ;;  %v3327_v29 = vpack.c.bf16 %v3321_v21, %v3320_v62 }
0x14a1   :  { %v3304_v17 = vadd.f32 1.0, %v5076_v63  ;;  %v5078_v19 = vpop.eup %5077 }
0x14a2   :  { %4602 = vmatpush3.bf16.msra.mxu1 %v3327_v29  ;;  %v3322_v25 = vmul.f32 %v5078_v19, %v3255_v14 }
0x14a3   :  { %5085 = vrcp.f32 %v3304_v17  ;;  %4603 = vmatprep.subr.bf16.mxu1 %v5204_v0 }
0x14a4   :  { %v5080_v22 = vpop.eup %5079 }
0x14a5   :  { %v5082_v23 = vpop.eup %5081  ;;  %v3305_v24 = vadd.f32 1.0, %v5080_v22 }
0x14a6   :  { %v3323_v26 = vmul.f32 %v5082_v23, %v3260_v32  ;;  %v3545_v32 = vld [vmem:[#allocation7 + $0x68] sm:$0xff] }
0x14a7   :  { %5087 = vrcp.f32 %v3305_v24  ;;  %v4796_v36 = vpack.c.bf16 %v3545_v32, %v3544_v28 }
0x14a8   :  { %v3328_v2 = vpack.c.bf16 %v3323_v26, %v3322_v25 }
0x14a9   :  { %v5084_v3 = vpop.eup %5083 }
0x14aa   :  { %4604 = vmatpush3.bf16.msra.mxu1 %v3328_v2  ;;  %v3324_v5 = vmul.f32 %v5084_v3, %v3265_v41 }
0x14ab   :  { %4605 = vmatprep.subr.bf16.mxu1 %v5204_v0 }
0x14ad   :  { %v5086_v4 = vpop.eup %5085 }
0x14ae   :  { %v3325_v7 = vmul.f32 %v5086_v4, %v3270_v45 }
0x14b0   :  { %v3329_v9 = vpack.c.bf16 %v3325_v7, %v3324_v5 }
0x14b1   :  { %v5088_v10 = vpop.eup %5087 }
0x14b2   :  { %v3326_v11 = vmul.f32 %v5088_v10, %v3275_v52  ;;  %4606 = vmatpush3.bf16.msra.mxu1 %v3329_v9 }
0x14b3   :  { %4607 = vmatprep.subr.bf16.mxu1 %v5204_v0 }
0x14b4   :  { %v3330_v12 = vpack.c.bf16 %v3326_v11, %v3326_v11 }
0x14b6   :  { %v3332_v20 = vsel %vm144_vm1, %v3330_v12, 0 }
0x14b7   :  { %4608 = vmatpush3.bf16.msra.mxu1 %v3332_v20 }
0x14b8   :  { %4789 = vmatprep.subr.bf16.mxu1 %v5206_v1 }
0x14ba   :  { %4610 = vmatmul.mubr.msk.bf16.vlgmr.msra.gmra.mrb[76].mxu1 %vm815_vm5, %v5922_v8 }
0x14bb   :  { %4791 = vmatpush3.bf16.msra.mxu1 %v4790_v30  ;;  %4632 = vmatprep.mubr.msk.f32.mxu1 %vm5205_vm0, %v5204_v0 }
0x14bc   :  { %4792 = vmatprep.subr.bf16.mxu1 %v5206_v1 }
0x14bf   :  { %4794 = vmatpush3.bf16.msra.mxu1 %v4793_v33 }
0x14c0   :  { %4801 = vmatprep.subr.bf16.mxu1 %v5206_v1 }
0x14c2   :  { %4633 = vmatmul.mubr.msk.f32.vlgmr.msra.gmra.mrb[80].mxu1 %vm222_vm3, %v5976_v56 }
0x14c3   :  { %4654 = vmatprep.mubr.msk.f32.mxu1 %vm5205_vm0, %v5204_v0 }
0x158d   :  { %v3368_v34 = vpop.f32.mrb[76].mxu1 }
0x158e   :  { %v4611_v35 = vpop.f32.mrb[77].mxu1  ;;  %4622 = vmatmul.mubr.msk.f32.vlgmr.msra.gmra.mrb[80].mxu0 %vm222_vm3, %v3368_v34 }
0x158f   :  { %v3371_v8 = vpop.f32.mrb[78].mxu1  ;;  %4643 = vmatprep.mubr.msk.f32.mxu0 %vm5205_vm0, %v5204_v0  ;;  %4797 = vmatpush3.bf16.msra.mxu0 %v4796_v36  ;;  %v3631_v0 = vld [vmem:[%s6137_s8 + $0x8] sm:$0xff] }
0x1590   :  { %v4612_v14 = vpop.f32.mrb[79].mxu1  ;;  %4798 = vmatprep.subr.bf16.mxu0 %v5206_v1  ;;  %v4802_v41 = vpack.c.bf16 %v3631_v0, %v3630_v40 }
0x1592   :  { %4803 = vmatpush3.bf16.msra.mxu1 %v4802_v41 }
0x1593   :  { %4800 = vmatpush3.bf16.msra.mxu0 %v4799_v39  ;;  %4804 = vmatprep.subr.bf16.mxu1 %v5206_v1  ;;  %v3632_v1 = vld [vmem:[%s6137_s8 + $0x10] sm:$0xff] }
0x1594   :  { %v4805_v52 = vpack.c.bf16 %v3633_v51, %v3632_v1 }
0x1595   :  { %v3523_v15 = vpop.f32.mrb[80].mxu1 }
0x1596   :  { %v4634_v27 = vpop.f32.mrb[81].mxu1  ;;  %4806 = vmatpush3.bf16.msra.mxu1 %v4805_v52 }
0x1661   :  { %v3453_v16 = vpop.f32.mrb[80].mxu0 }
0x1662   :  { %v3524_v43 = vadd.f32 %v3523_v15, %v3453_v16  ;;  %v4623_v44 = vpop.f32.mrb[81].mxu0 }
0x1664   :  { %v3535_v46 = vadd.f32 %v3959_v42, %v3524_v43 }
0x1666   :  { %v3960_v45 = vmul.f32 -1.442695, %v3535_v46 }
0x1668   :  { %5089 = vpow2.f32 %v3960_v45 }
0x1672   :  { %v5090_v47 = vpop.eup %5089 }
0x1673   :  { %v3539_v48 = vadd.f32 1.0, %v5090_v47 }
0x1675   :  { %5091 = vrcp.f32 %v3539_v48 }
0x167f   :  { %v5092_v49 = vpop.eup %5091 }
0x1680   :  { %v3542_v50 = vmul.f32 %v5092_v49, %v3535_v46 }
0x1682   :  { %4644 = vmatmul.mubr.msk.f32.vlgmr.msra.gmra.mrb[82].mxu0 %vm222_vm3, %v3542_v50 }
0x1755   :  { %v3625_v54 = vpop.f32.mrb[82].mxu0 }
0x1756   :  { %v3626_v55 = vadd.f32 %v3962_v53, %v3625_v54  ;;  %v4645_v58 = vpop.f32.mrb[83].mxu0 }
0x1758   :  { %v3629_v57 = vadd.f32 %v3626_v55, %v5976_v56 }
0x175a   :  { %4655 = vmatmul.mubr.msk.f32.vlgmr.msra.gmra.mrb[82].mxu1 %vm222_vm3, %v3629_v57 }
0x182d   :  { %v3710_v60 = vpop.f32.mrb[82].mxu1 }
0x182e   :  { %v3711_v61 = vadd.f32 %v3964_v59, %v3710_v60  ;;  %v4656_v62 = vpop.f32.mrb[83].mxu1 }
0x1830   :  { %3714 = vst.msk [vmem:[%s6148_s19] sm:$0xff] %vm140_vm2, %v3711_v61 }
0x1831   :  { %3719 = vsyncpa [#allocation3], 1 }
0x1832   :  { %3720 = vsyncpa [#allocation5], 1 }
0x1833   :  { %3721 = vsyncpa [#allocation8], 1 }

</bundles_post_ra>
